<compile_context>
chip_gen: v7x
topology: tpu7x:2x2x1
jax: 0.10.0
libtpu: 0.0.40
codegen_flags: <defaults>
</compile_context>

<pallas_src>
import jax
import jax.numpy as jnp
import numpy as np
from jax.experimental import pallas as pl
from jax.experimental.pallas import tpu as pltpu

C_IN, C_OUT, K = 4, 32, 12
L_IN = 111
L_CONV = L_IN - K + 1          # 100
POOL = 4
L_POOL = L_CONV // POOL        # 25
F1_IN = C_OUT * L_POOL         # 800
F1_OUT = 16
F2_OUT = 2
MAX_B = 128                    # batch block: multiple of 32 -> lane-dense slabs;
                               # capped at 128 so large N keeps >=2 grid blocks (v7x 2 TCs)
                               # and the block footprint stays far under v7x's 64 MiB VMEM.


def _round_up(a, b):
    return (a + b - 1) // b * b


def _mymodel_kernel(cols_ref, wck_ref, bc_ref, w1s_ref, b1_ref, w2_ref, b2_ref,
                    out_ref):
    # cols_ref block: (POOL, 48, B*25); lane index = j*B + b  (j = pool pos, b = sample)
    b25 = cols_ref.shape[2]
    bsz = b25 // L_POOL

    wck = wck_ref[...]                                          # (32, 48)

    # ---- Conv1d(4->32, k=12) + MaxPool1d(4): 4 MXU matmuls + elementwise max ----
    pooled = None
    for p in range(POOL):
        conv_p = jnp.dot(wck, cols_ref[p],
                         preferred_element_type=jnp.float32)    # (32, B*25)
        pooled = conv_p if pooled is None else jnp.maximum(pooled, conv_p)
    pooled = pooled + bc_ref[...]        # bias commutes with the max (constant per row)

    # ---- Flatten + fc1: 25 accumulated (16,32)@(32,B) matmuls on B-aligned slices ----
    h = None
    for j in range(L_POOL):
        pj = pooled[:, j * bsz:(j + 1) * bsz]                   # (32, B) static lane slice
        term = jnp.dot(w1s_ref[j], pj,
                       preferred_element_type=jnp.float32)      # (16, B)
        h = term if h is None else h + term
    h = jnp.maximum(h + b1_ref[...], 0.0)                       # ReLU, (16, B)

    # ---- fc2 (tiny: M=2, K=16; cost is negligible) ----
    logits = jnp.dot(w2_ref[...], h,
                     preferred_element_type=jnp.float32) + b2_ref[...]   # (2, B)

    # ---- Softmax over the 2 classes (explicit 2-row form: pure VPU/EUP) ----
    l0 = logits[0:1, :]
    l1 = logits[1:2, :]
    m = jnp.maximum(l0, l1)
    e0 = jnp.exp(l0 - m)
    e1 = jnp.exp(l1 - m)
    # approx=True would move the divide to the EUP, but exact keeps the output
    # within the 1e-4 check tolerance; this epilogue is tiny either way.
    inv = pl.reciprocal(e0 + e1, approx=False)
    out_ref[...] = jnp.concatenate([e0 * inv, e1 * inv], axis=0)   # (2, B), lane-dense


def mymodel_forward(x, params):
    """Fused forward pass. x: (N, 4, 111) f32, returns (N, 2) f32 softmax probs."""
    wc, bc, w1, b1, w2, b2 = params
    n = x.shape[0]

    bsz = min(MAX_B, _round_up(max(n, 1), 32))
    n_pad = _round_up(n, bsz)
    nblk = n_pad // bsz
    if n_pad != n:
        x = jnp.pad(x, ((0, n_pad - n), (0, 0), (0, 0)))

    # ---- im2col in the wrapper (XLA): no misaligned slice/concat inside the kernel ----
    # patches[n, k*C_IN + ci, t] = x[n, ci, t + k]
    patches = jnp.stack([x[:, :, k:k + L_CONV] for k in range(K)], axis=1)
    patches = patches.reshape(n_pad, K * C_IN, L_CONV)
    # Split t -> (j, p) and n -> (block, b); per-block lane index = j*B + b so the
    # fc1 stage consumes B-aligned lane slices with no in-kernel transpose.
    cols = patches.reshape(nblk, bsz, K * C_IN, L_POOL, POOL)
    cols = jnp.transpose(cols, (4, 2, 0, 3, 1))            # (POOL, 48, nblk, 25, B)
    cols = cols.reshape(POOL, K * C_IN, n_pad * L_POOL)    # (4, 48, n_pad*25)

    # ---- parameter plumbing (pure JAX) ----
    # NOTE: casting cols/weights to bf16 would better feed the v6e/v7x MXU, but it
    # breaks the rtol=1e-3/atol=1e-4 check against the f32 reference, so keep f32.
    wck = jnp.transpose(wc, (0, 2, 1)).reshape(C_OUT, K * C_IN)        # (32, 48), col = k*4+ci
    bc_col = bc.reshape(C_OUT, 1)
    # w1s[j, f, co] = w1[f, co*25 + j]  (matches the kernel's per-j lane slabs)
    w1s = jnp.transpose(w1.reshape(F1_OUT, C_OUT, L_POOL), (2, 0, 1))  # (25, 16, 32)
    b1_col = b1.reshape(F1_OUT, 1)
    b2_col = b2.reshape(F2_OUT, 1)

    out_t = pl.pallas_call(
        _mymodel_kernel,
        out_shape=jax.ShapeDtypeStruct((F2_OUT, n_pad), jnp.float32),
        grid=(nblk,),
        in_specs=[
            pl.BlockSpec((POOL, K * C_IN, bsz * L_POOL), lambda i: (0, 0, i)),  # im2col
            pl.BlockSpec((C_OUT, K * C_IN), lambda i: (0, 0)),                  # conv W
            pl.BlockSpec((C_OUT, 1), lambda i: (0, 0)),                         # conv b
            pl.BlockSpec((L_POOL, F1_OUT, C_OUT), lambda i: (0, 0, 0)),         # fc1 W (permuted)
            pl.BlockSpec((F1_OUT, 1), lambda i: (0, 0)),                        # fc1 b
            pl.BlockSpec((F2_OUT, F1_OUT), lambda i: (0, 0)),                   # fc2 W
            pl.BlockSpec((F2_OUT, 1), lambda i: (0, 0)),                        # fc2 b
        ],
        out_specs=pl.BlockSpec((F2_OUT, bsz), lambda i: (0, i)),
        compiler_params=pltpu.CompilerParams(
            dimension_semantics=("parallel",),
            vmem_limit_bytes=32 * 1024 * 1024),
    )(cols, wck, bc_col, w1s, b1_col, w2, b2_col)

    return out_t.T[:n]


def reference_forward(x, params):
    """Pure-JAX reference mirroring the PyTorch forward exactly."""
    wc, bc, w1, b1, w2, b2 = params
    n = x.shape[0]
    conv = jax.lax.conv_general_dilated(
        x, wc, window_strides=(1,), padding="VALID",
        dimension_numbers=("NCH", "OIH", "NCH")) + bc[None, :, None]   # (N,32,100)
    pooled = jnp.max(conv.reshape(n, C_OUT, L_POOL, POOL), axis=-1)    # (N,32,25)
    flat = pooled.reshape(n, F1_IN)                                    # (N,800)
    h = jnp.maximum(flat @ w1.T + b1, 0.0)                             # (N,16)
    logits = h @ w2.T + b2                                             # (N,2)
    return jax.nn.softmax(logits, axis=1)


def make_params(key):
    ks = jax.random.split(key, 6)
    wc = jax.random.normal(ks[0], (C_OUT, C_IN, K), jnp.float32) * 0.10
    bc = jax.random.normal(ks[1], (C_OUT,), jnp.float32) * 0.10
    w1 = jax.random.normal(ks[2], (F1_OUT, F1_IN), jnp.float32) * 0.05
    b1 = jax.random.normal(ks[3], (F1_OUT,), jnp.float32) * 0.05
    w2 = jax.random.normal(ks[4], (F2_OUT, F1_OUT), jnp.float32) * 0.10
    b2 = jax.random.normal(ks[5], (F2_OUT,), jnp.float32) * 0.10
    return (wc, bc, w1, b1, w2, b2)


if __name__ == "__main__":
    key = jax.random.PRNGKey(0)
    kp, kx1, kx2 = jax.random.split(key, 3)
    params = make_params(kp)

    fwd = jax.jit(mymodel_forward)

    # Small shape implied by the module (fc1 in_features = 32*25 -> L_IN = 111).
    x_small = jax.random.normal(kx1, (2, C_IN, L_IN), jnp.float32)
    out_small = jax.block_until_ready(fwd(x_small, params))
    ref_small = jax.block_until_ready(reference_forward(x_small, params))
    np.testing.assert_allclose(np.asarray(out_small), np.asarray(ref_small),
                               rtol=1e-3, atol=1e-4)
    assert out_small.shape == (2, F2_OUT)

    # Larger batch exercising the multi-block grid (B=128, padding, megacore path).
    x_big = jax.random.normal(kx2, (300, C_IN, L_IN), jnp.float32)
    out_big = jax.block_until_ready(fwd(x_big, params))
    ref_big = jax.block_until_ready(reference_forward(x_big, params))
    np.testing.assert_allclose(np.asarray(out_big), np.asarray(ref_big),
                               rtol=1e-3, atol=1e-4)
    assert out_big.shape == (300, F2_OUT)

    print("KERNEL_OK")
</pallas_src>

<mosaic_0001>
module attributes {stable_mosaic.version = 11 : i64} {
  func.func @_mymodel_kernel(%arg0: i32, %arg1: memref<4x48x800xf32, #tpu.memory_space<vmem>>, %arg2: memref<32x48xf32, #tpu.memory_space<vmem>>, %arg3: memref<32x1xf32, #tpu.memory_space<vmem>>, %arg4: memref<25x16x32xf32, #tpu.memory_space<vmem>>, %arg5: memref<16x1xf32, #tpu.memory_space<vmem>>, %arg6: memref<2x16xf32, #tpu.memory_space<vmem>>, %arg7: memref<2x1xf32, #tpu.memory_space<vmem>>, %arg8: memref<2x32xf32, #tpu.memory_space<vmem>>) attributes {dimension_semantics = [#tpu.dimension_semantics<parallel>], iteration_bounds = array<i64: 1>, scalar_prefetch = 0 : i64, scratch_operands = 0 : i64, tpu.core_type = #tpu.core_type<tc>, window_params = [{transform_indices = @transform_0, window_bounds = array<i64: 4, 48, 800>}, {pipeline_mode = #tpu.pipeline_mode<synchronous>, transform_indices = @transform_1, window_bounds = array<i64: 32, 48>}, {pipeline_mode = #tpu.pipeline_mode<synchronous>, transform_indices = @transform_2, window_bounds = array<i64: 32, 1>}, {pipeline_mode = #tpu.pipeline_mode<synchronous>, transform_indices = @transform_3, window_bounds = array<i64: 25, 16, 32>}, {pipeline_mode = #tpu.pipeline_mode<synchronous>, transform_indices = @transform_4, window_bounds = array<i64: 16, 1>}, {pipeline_mode = #tpu.pipeline_mode<synchronous>, transform_indices = @transform_5, window_bounds = array<i64: 2, 16>}, {pipeline_mode = #tpu.pipeline_mode<synchronous>, transform_indices = @transform_6, window_bounds = array<i64: 2, 1>}, {transform_indices = @transform_7, window_bounds = array<i64: 2, 32>}]} {
    %c0 = arith.constant 0 : index
    %c0_0 = arith.constant 0 : index
    %0 = vector.load %arg2[%c0, %c0_0] : memref<32x48xf32, #tpu.memory_space<vmem>>, vector<32x48xf32>
    %c0_1 = arith.constant 0 : index
    %c0_2 = arith.constant 0 : index
    %c0_3 = arith.constant 0 : index
    %1 = vector.load %arg1[%c0_1, %c0_2, %c0_3] : memref<4x48x800xf32, #tpu.memory_space<vmem>>, vector<1x48x800xf32>
    %2 = vector.shape_cast %1 : vector<1x48x800xf32> to vector<48x800xf32>
    %cst = arith.constant dense<0.000000e+00> : vector<32x800xf32>
    %3 = tpu.matmul %0, %2, %cst {dimension_numbers = #tpu.dot_dimension_numbers<[1], [0], [0], [1], [0, 0, 1, 1], [], []>} : vector<32x48xf32>, vector<48x800xf32>, vector<32x800xf32> -> vector<32x800xf32>
    %c1 = arith.constant 1 : index
    %c0_4 = arith.constant 0 : index
    %c0_5 = arith.constant 0 : index
    %4 = vector.load %arg1[%c1, %c0_4, %c0_5] : memref<4x48x800xf32, #tpu.memory_space<vmem>>, vector<1x48x800xf32>
    %5 = vector.shape_cast %4 : vector<1x48x800xf32> to vector<48x800xf32>
    %cst_6 = arith.constant dense<0.000000e+00> : vector<32x800xf32>
    %6 = tpu.matmul %0, %5, %cst_6 {dimension_numbers = #tpu.dot_dimension_numbers<[1], [0], [0], [1], [0, 0, 1, 1], [], []>} : vector<32x48xf32>, vector<48x800xf32>, vector<32x800xf32> -> vector<32x800xf32>
    %7 = arith.maximumf %3, %6 : vector<32x800xf32>
    %c2 = arith.constant 2 : index
    %c0_7 = arith.constant 0 : index
    %c0_8 = arith.constant 0 : index
    %8 = vector.load %arg1[%c2, %c0_7, %c0_8] : memref<4x48x800xf32, #tpu.memory_space<vmem>>, vector<1x48x800xf32>
    %9 = vector.shape_cast %8 : vector<1x48x800xf32> to vector<48x800xf32>
    %cst_9 = arith.constant dense<0.000000e+00> : vector<32x800xf32>
    %10 = tpu.matmul %0, %9, %cst_9 {dimension_numbers = #tpu.dot_dimension_numbers<[1], [0], [0], [1], [0, 0, 1, 1], [], []>} : vector<32x48xf32>, vector<48x800xf32>, vector<32x800xf32> -> vector<32x800xf32>
    %11 = arith.maximumf %7, %10 : vector<32x800xf32>
    %c3 = arith.constant 3 : index
    %c0_10 = arith.constant 0 : index
    %c0_11 = arith.constant 0 : index
    %12 = vector.load %arg1[%c3, %c0_10, %c0_11] : memref<4x48x800xf32, #tpu.memory_space<vmem>>, vector<1x48x800xf32>
    %13 = vector.shape_cast %12 : vector<1x48x800xf32> to vector<48x800xf32>
    %cst_12 = arith.constant dense<0.000000e+00> : vector<32x800xf32>
    %14 = tpu.matmul %0, %13, %cst_12 {dimension_numbers = #tpu.dot_dimension_numbers<[1], [0], [0], [1], [0, 0, 1, 1], [], []>} : vector<32x48xf32>, vector<48x800xf32>, vector<32x800xf32> -> vector<32x800xf32>
    %15 = arith.maximumf %11, %14 : vector<32x800xf32>
    %c0_13 = arith.constant 0 : index
    %c0_14 = arith.constant 0 : index
    %16 = vector.load %arg3[%c0_13, %c0_14] : memref<32x1xf32, #tpu.memory_space<vmem>>, vector<32x1xf32>
    %17 = vector.broadcast %16 : vector<32x1xf32> to vector<32x800xf32>
    %18 = arith.addf %15, %17 : vector<32x800xf32>
    %19 = vector.extract_strided_slice %18 {offsets = [0, 0], sizes = [32, 32], strides = [1, 1]} : vector<32x800xf32> to vector<32x32xf32>
    %c0_15 = arith.constant 0 : index
    %c0_16 = arith.constant 0 : index
    %c0_17 = arith.constant 0 : index
    %20 = vector.load %arg4[%c0_15, %c0_16, %c0_17] : memref<25x16x32xf32, #tpu.memory_space<vmem>>, vector<1x16x32xf32>
    %21 = vector.shape_cast %20 : vector<1x16x32xf32> to vector<16x32xf32>
    %cst_18 = arith.constant dense<0.000000e+00> : vector<16x32xf32>
    %22 = tpu.matmul %21, %19, %cst_18 {dimension_numbers = #tpu.dot_dimension_numbers<[1], [0], [0], [1], [0, 0, 1, 1], [], []>} : vector<16x32xf32>, vector<32x32xf32>, vector<16x32xf32> -> vector<16x32xf32>
    %23 = vector.extract_strided_slice %18 {offsets = [0, 32], sizes = [32, 32], strides = [1, 1]} : vector<32x800xf32> to vector<32x32xf32>
    %c1_19 = arith.constant 1 : index
    %c0_20 = arith.constant 0 : index
    %c0_21 = arith.constant 0 : index
    %24 = vector.load %arg4[%c1_19, %c0_20, %c0_21] : memref<25x16x32xf32, #tpu.memory_space<vmem>>, vector<1x16x32xf32>
    %25 = vector.shape_cast %24 : vector<1x16x32xf32> to vector<16x32xf32>
    %cst_22 = arith.constant dense<0.000000e+00> : vector<16x32xf32>
    %26 = tpu.matmul %25, %23, %cst_22 {dimension_numbers = #tpu.dot_dimension_numbers<[1], [0], [0], [1], [0, 0, 1, 1], [], []>} : vector<16x32xf32>, vector<32x32xf32>, vector<16x32xf32> -> vector<16x32xf32>
    %27 = arith.addf %22, %26 : vector<16x32xf32>
    %28 = vector.extract_strided_slice %18 {offsets = [0, 64], sizes = [32, 32], strides = [1, 1]} : vector<32x800xf32> to vector<32x32xf32>
    %c2_23 = arith.constant 2 : index
    %c0_24 = arith.constant 0 : index
    %c0_25 = arith.constant 0 : index
    %29 = vector.load %arg4[%c2_23, %c0_24, %c0_25] : memref<25x16x32xf32, #tpu.memory_space<vmem>>, vector<1x16x32xf32>
    %30 = vector.shape_cast %29 : vector<1x16x32xf32> to vector<16x32xf32>
    %cst_26 = arith.constant dense<0.000000e+00> : vector<16x32xf32>
    %31 = tpu.matmul %30, %28, %cst_26 {dimension_numbers = #tpu.dot_dimension_numbers<[1], [0], [0], [1], [0, 0, 1, 1], [], []>} : vector<16x32xf32>, vector<32x32xf32>, vector<16x32xf32> -> vector<16x32xf32>
    %32 = arith.addf %27, %31 : vector<16x32xf32>
    %33 = vector.extract_strided_slice %18 {offsets = [0, 96], sizes = [32, 32], strides = [1, 1]} : vector<32x800xf32> to vector<32x32xf32>
    %c3_27 = arith.constant 3 : index
    %c0_28 = arith.constant 0 : index
    %c0_29 = arith.constant 0 : index
    %34 = vector.load %arg4[%c3_27, %c0_28, %c0_29] : memref<25x16x32xf32, #tpu.memory_space<vmem>>, vector<1x16x32xf32>
    %35 = vector.shape_cast %34 : vector<1x16x32xf32> to vector<16x32xf32>
    %cst_30 = arith.constant dense<0.000000e+00> : vector<16x32xf32>
    %36 = tpu.matmul %35, %33, %cst_30 {dimension_numbers = #tpu.dot_dimension_numbers<[1], [0], [0], [1], [0, 0, 1, 1], [], []>} : vector<16x32xf32>, vector<32x32xf32>, vector<16x32xf32> -> vector<16x32xf32>
    %37 = arith.addf %32, %36 : vector<16x32xf32>
    %38 = vector.extract_strided_slice %18 {offsets = [0, 128], sizes = [32, 32], strides = [1, 1]} : vector<32x800xf32> to vector<32x32xf32>
    %c4 = arith.constant 4 : index
    %c0_31 = arith.constant 0 : index
    %c0_32 = arith.constant 0 : index
    %39 = vector.load %arg4[%c4, %c0_31, %c0_32] : memref<25x16x32xf32, #tpu.memory_space<vmem>>, vector<1x16x32xf32>
    %40 = vector.shape_cast %39 : vector<1x16x32xf32> to vector<16x32xf32>
    %cst_33 = arith.constant dense<0.000000e+00> : vector<16x32xf32>
    %41 = tpu.matmul %40, %38, %cst_33 {dimension_numbers = #tpu.dot_dimension_numbers<[1], [0], [0], [1], [0, 0, 1, 1], [], []>} : vector<16x32xf32>, vector<32x32xf32>, vector<16x32xf32> -> vector<16x32xf32>
    %42 = arith.addf %37, %41 : vector<16x32xf32>
    %43 = vector.extract_strided_slice %18 {offsets = [0, 160], sizes = [32, 32], strides = [1, 1]} : vector<32x800xf32> to vector<32x32xf32>
    %c5 = arith.constant 5 : index
    %c0_34 = arith.constant 0 : index
    %c0_35 = arith.constant 0 : index
    %44 = vector.load %arg4[%c5, %c0_34, %c0_35] : memref<25x16x32xf32, #tpu.memory_space<vmem>>, vector<1x16x32xf32>
    %45 = vector.shape_cast %44 : vector<1x16x32xf32> to vector<16x32xf32>
    %cst_36 = arith.constant dense<0.000000e+00> : vector<16x32xf32>
    %46 = tpu.matmul %45, %43, %cst_36 {dimension_numbers = #tpu.dot_dimension_numbers<[1], [0], [0], [1], [0, 0, 1, 1], [], []>} : vector<16x32xf32>, vector<32x32xf32>, vector<16x32xf32> -> vector<16x32xf32>
    %47 = arith.addf %42, %46 : vector<16x32xf32>
    %48 = vector.extract_strided_slice %18 {offsets = [0, 192], sizes = [32, 32], strides = [1, 1]} : vector<32x800xf32> to vector<32x32xf32>
    %c6 = arith.constant 6 : index
    %c0_37 = arith.constant 0 : index
    %c0_38 = arith.constant 0 : index
    %49 = vector.load %arg4[%c6, %c0_37, %c0_38] : memref<25x16x32xf32, #tpu.memory_space<vmem>>, vector<1x16x32xf32>
    %50 = vector.shape_cast %49 : vector<1x16x32xf32> to vector<16x32xf32>
    %cst_39 = arith.constant dense<0.000000e+00> : vector<16x32xf32>
    %51 = tpu.matmul %50, %48, %cst_39 {dimension_numbers = #tpu.dot_dimension_numbers<[1], [0], [0], [1], [0, 0, 1, 1], [], []>} : vector<16x32xf32>, vector<32x32xf32>, vector<16x32xf32> -> vector<16x32xf32>
    %52 = arith.addf %47, %51 : vector<16x32xf32>
    %53 = vector.extract_strided_slice %18 {offsets = [0, 224], sizes = [32, 32], strides = [1, 1]} : vector<32x800xf32> to vector<32x32xf32>
    %c7 = arith.constant 7 : index
    %c0_40 = arith.constant 0 : index
    %c0_41 = arith.constant 0 : index
    %54 = vector.load %arg4[%c7, %c0_40, %c0_41] : memref<25x16x32xf32, #tpu.memory_space<vmem>>, vector<1x16x32xf32>
    %55 = vector.shape_cast %54 : vector<1x16x32xf32> to vector<16x32xf32>
    %cst_42 = arith.constant dense<0.000000e+00> : vector<16x32xf32>
    %56 = tpu.matmul %55, %53, %cst_42 {dimension_numbers = #tpu.dot_dimension_numbers<[1], [0], [0], [1], [0, 0, 1, 1], [], []>} : vector<16x32xf32>, vector<32x32xf32>, vector<16x32xf32> -> vector<16x32xf32>
    %57 = arith.addf %52, %56 : vector<16x32xf32>
    %58 = vector.extract_strided_slice %18 {offsets = [0, 256], sizes = [32, 32], strides = [1, 1]} : vector<32x800xf32> to vector<32x32xf32>
    %c8 = arith.constant 8 : index
    %c0_43 = arith.constant 0 : index
    %c0_44 = arith.constant 0 : index
    %59 = vector.load %arg4[%c8, %c0_43, %c0_44] : memref<25x16x32xf32, #tpu.memory_space<vmem>>, vector<1x16x32xf32>
    %60 = vector.shape_cast %59 : vector<1x16x32xf32> to vector<16x32xf32>
    %cst_45 = arith.constant dense<0.000000e+00> : vector<16x32xf32>
    %61 = tpu.matmul %60, %58, %cst_45 {dimension_numbers = #tpu.dot_dimension_numbers<[1], [0], [0], [1], [0, 0, 1, 1], [], []>} : vector<16x32xf32>, vector<32x32xf32>, vector<16x32xf32> -> vector<16x32xf32>
    %62 = arith.addf %57, %61 : vector<16x32xf32>
    %63 = vector.extract_strided_slice %18 {offsets = [0, 288], sizes = [32, 32], strides = [1, 1]} : vector<32x800xf32> to vector<32x32xf32>
    %c9 = arith.constant 9 : index
    %c0_46 = arith.constant 0 : index
    %c0_47 = arith.constant 0 : index
    %64 = vector.load %arg4[%c9, %c0_46, %c0_47] : memref<25x16x32xf32, #tpu.memory_space<vmem>>, vector<1x16x32xf32>
    %65 = vector.shape_cast %64 : vector<1x16x32xf32> to vector<16x32xf32>
    %cst_48 = arith.constant dense<0.000000e+00> : vector<16x32xf32>
    %66 = tpu.matmul %65, %63, %cst_48 {dimension_numbers = #tpu.dot_dimension_numbers<[1], [0], [0], [1], [0, 0, 1, 1], [], []>} : vector<16x32xf32>, vector<32x32xf32>, vector<16x32xf32> -> vector<16x32xf32>
    %67 = arith.addf %62, %66 : vector<16x32xf32>
    %68 = vector.extract_strided_slice %18 {offsets = [0, 320], sizes = [32, 32], strides = [1, 1]} : vector<32x800xf32> to vector<32x32xf32>
    %c10 = arith.constant 10 : index
    %c0_49 = arith.constant 0 : index
    %c0_50 = arith.constant 0 : index
    %69 = vector.load %arg4[%c10, %c0_49, %c0_50] : memref<25x16x32xf32, #tpu.memory_space<vmem>>, vector<1x16x32xf32>
    %70 = vector.shape_cast %69 : vector<1x16x32xf32> to vector<16x32xf32>
    %cst_51 = arith.constant dense<0.000000e+00> : vector<16x32xf32>
    %71 = tpu.matmul %70, %68, %cst_51 {dimension_numbers = #tpu.dot_dimension_numbers<[1], [0], [0], [1], [0, 0, 1, 1], [], []>} : vector<16x32xf32>, vector<32x32xf32>, vector<16x32xf32> -> vector<16x32xf32>
    %72 = arith.addf %67, %71 : vector<16x32xf32>
    %73 = vector.extract_strided_slice %18 {offsets = [0, 352], sizes = [32, 32], strides = [1, 1]} : vector<32x800xf32> to vector<32x32xf32>
    %c11 = arith.constant 11 : index
    %c0_52 = arith.constant 0 : index
    %c0_53 = arith.constant 0 : index
    %74 = vector.load %arg4[%c11, %c0_52, %c0_53] : memref<25x16x32xf32, #tpu.memory_space<vmem>>, vector<1x16x32xf32>
    %75 = vector.shape_cast %74 : vector<1x16x32xf32> to vector<16x32xf32>
    %cst_54 = arith.constant dense<0.000000e+00> : vector<16x32xf32>
    %76 = tpu.matmul %75, %73, %cst_54 {dimension_numbers = #tpu.dot_dimension_numbers<[1], [0], [0], [1], [0, 0, 1, 1], [], []>} : vector<16x32xf32>, vector<32x32xf32>, vector<16x32xf32> -> vector<16x32xf32>
    %77 = arith.addf %72, %76 : vector<16x32xf32>
    %78 = vector.extract_strided_slice %18 {offsets = [0, 384], sizes = [32, 32], strides = [1, 1]} : vector<32x800xf32> to vector<32x32xf32>
    %c12 = arith.constant 12 : index
    %c0_55 = arith.constant 0 : index
    %c0_56 = arith.constant 0 : index
    %79 = vector.load %arg4[%c12, %c0_55, %c0_56] : memref<25x16x32xf32, #tpu.memory_space<vmem>>, vector<1x16x32xf32>
    %80 = vector.shape_cast %79 : vector<1x16x32xf32> to vector<16x32xf32>
    %cst_57 = arith.constant dense<0.000000e+00> : vector<16x32xf32>
    %81 = tpu.matmul %80, %78, %cst_57 {dimension_numbers = #tpu.dot_dimension_numbers<[1], [0], [0], [1], [0, 0, 1, 1], [], []>} : vector<16x32xf32>, vector<32x32xf32>, vector<16x32xf32> -> vector<16x32xf32>
    %82 = arith.addf %77, %81 : vector<16x32xf32>
    %83 = vector.extract_strided_slice %18 {offsets = [0, 416], sizes = [32, 32], strides = [1, 1]} : vector<32x800xf32> to vector<32x32xf32>
    %c13 = arith.constant 13 : index
    %c0_58 = arith.constant 0 : index
    %c0_59 = arith.constant 0 : index
    %84 = vector.load %arg4[%c13, %c0_58, %c0_59] : memref<25x16x32xf32, #tpu.memory_space<vmem>>, vector<1x16x32xf32>
    %85 = vector.shape_cast %84 : vector<1x16x32xf32> to vector<16x32xf32>
    %cst_60 = arith.constant dense<0.000000e+00> : vector<16x32xf32>
    %86 = tpu.matmul %85, %83, %cst_60 {dimension_numbers = #tpu.dot_dimension_numbers<[1], [0], [0], [1], [0, 0, 1, 1], [], []>} : vector<16x32xf32>, vector<32x32xf32>, vector<16x32xf32> -> vector<16x32xf32>
    %87 = arith.addf %82, %86 : vector<16x32xf32>
    %88 = vector.extract_strided_slice %18 {offsets = [0, 448], sizes = [32, 32], strides = [1, 1]} : vector<32x800xf32> to vector<32x32xf32>
    %c14 = arith.constant 14 : index
    %c0_61 = arith.constant 0 : index
    %c0_62 = arith.constant 0 : index
    %89 = vector.load %arg4[%c14, %c0_61, %c0_62] : memref<25x16x32xf32, #tpu.memory_space<vmem>>, vector<1x16x32xf32>
    %90 = vector.shape_cast %89 : vector<1x16x32xf32> to vector<16x32xf32>
    %cst_63 = arith.constant dense<0.000000e+00> : vector<16x32xf32>
    %91 = tpu.matmul %90, %88, %cst_63 {dimension_numbers = #tpu.dot_dimension_numbers<[1], [0], [0], [1], [0, 0, 1, 1], [], []>} : vector<16x32xf32>, vector<32x32xf32>, vector<16x32xf32> -> vector<16x32xf32>
    %92 = arith.addf %87, %91 : vector<16x32xf32>
    %93 = vector.extract_strided_slice %18 {offsets = [0, 480], sizes = [32, 32], strides = [1, 1]} : vector<32x800xf32> to vector<32x32xf32>
    %c15 = arith.constant 15 : index
    %c0_64 = arith.constant 0 : index
    %c0_65 = arith.constant 0 : index
    %94 = vector.load %arg4[%c15, %c0_64, %c0_65] : memref<25x16x32xf32, #tpu.memory_space<vmem>>, vector<1x16x32xf32>
    %95 = vector.shape_cast %94 : vector<1x16x32xf32> to vector<16x32xf32>
    %cst_66 = arith.constant dense<0.000000e+00> : vector<16x32xf32>
    %96 = tpu.matmul %95, %93, %cst_66 {dimension_numbers = #tpu.dot_dimension_numbers<[1], [0], [0], [1], [0, 0, 1, 1], [], []>} : vector<16x32xf32>, vector<32x32xf32>, vector<16x32xf32> -> vector<16x32xf32>
    %97 = arith.addf %92, %96 : vector<16x32xf32>
    %98 = vector.extract_strided_slice %18 {offsets = [0, 512], sizes = [32, 32], strides = [1, 1]} : vector<32x800xf32> to vector<32x32xf32>
    %c16 = arith.constant 16 : index
    %c0_67 = arith.constant 0 : index
    %c0_68 = arith.constant 0 : index
    %99 = vector.load %arg4[%c16, %c0_67, %c0_68] : memref<25x16x32xf32, #tpu.memory_space<vmem>>, vector<1x16x32xf32>
    %100 = vector.shape_cast %99 : vector<1x16x32xf32> to vector<16x32xf32>
    %cst_69 = arith.constant dense<0.000000e+00> : vector<16x32xf32>
    %101 = tpu.matmul %100, %98, %cst_69 {dimension_numbers = #tpu.dot_dimension_numbers<[1], [0], [0], [1], [0, 0, 1, 1], [], []>} : vector<16x32xf32>, vector<32x32xf32>, vector<16x32xf32> -> vector<16x32xf32>
    %102 = arith.addf %97, %101 : vector<16x32xf32>
    %103 = vector.extract_strided_slice %18 {offsets = [0, 544], sizes = [32, 32], strides = [1, 1]} : vector<32x800xf32> to vector<32x32xf32>
    %c17 = arith.constant 17 : index
    %c0_70 = arith.constant 0 : index
    %c0_71 = arith.constant 0 : index
    %104 = vector.load %arg4[%c17, %c0_70, %c0_71] : memref<25x16x32xf32, #tpu.memory_space<vmem>>, vector<1x16x32xf32>
    %105 = vector.shape_cast %104 : vector<1x16x32xf32> to vector<16x32xf32>
    %cst_72 = arith.constant dense<0.000000e+00> : vector<16x32xf32>
    %106 = tpu.matmul %105, %103, %cst_72 {dimension_numbers = #tpu.dot_dimension_numbers<[1], [0], [0], [1], [0, 0, 1, 1], [], []>} : vector<16x32xf32>, vector<32x32xf32>, vector<16x32xf32> -> vector<16x32xf32>
    %107 = arith.addf %102, %106 : vector<16x32xf32>
    %108 = vector.extract_strided_slice %18 {offsets = [0, 576], sizes = [32, 32], strides = [1, 1]} : vector<32x800xf32> to vector<32x32xf32>
    %c18 = arith.constant 18 : index
    %c0_73 = arith.constant 0 : index
    %c0_74 = arith.constant 0 : index
    %109 = vector.load %arg4[%c18, %c0_73, %c0_74] : memref<25x16x32xf32, #tpu.memory_space<vmem>>, vector<1x16x32xf32>
    %110 = vector.shape_cast %109 : vector<1x16x32xf32> to vector<16x32xf32>
    %cst_75 = arith.constant dense<0.000000e+00> : vector<16x32xf32>
    %111 = tpu.matmul %110, %108, %cst_75 {dimension_numbers = #tpu.dot_dimension_numbers<[1], [0], [0], [1], [0, 0, 1, 1], [], []>} : vector<16x32xf32>, vector<32x32xf32>, vector<16x32xf32> -> vector<16x32xf32>
    %112 = arith.addf %107, %111 : vector<16x32xf32>
    %113 = vector.extract_strided_slice %18 {offsets = [0, 608], sizes = [32, 32], strides = [1, 1]} : vector<32x800xf32> to vector<32x32xf32>
    %c19 = arith.constant 19 : index
    %c0_76 = arith.constant 0 : index
    %c0_77 = arith.constant 0 : index
    %114 = vector.load %arg4[%c19, %c0_76, %c0_77] : memref<25x16x32xf32, #tpu.memory_space<vmem>>, vector<1x16x32xf32>
    %115 = vector.shape_cast %114 : vector<1x16x32xf32> to vector<16x32xf32>
    %cst_78 = arith.constant dense<0.000000e+00> : vector<16x32xf32>
    %116 = tpu.matmul %115, %113, %cst_78 {dimension_numbers = #tpu.dot_dimension_numbers<[1], [0], [0], [1], [0, 0, 1, 1], [], []>} : vector<16x32xf32>, vector<32x32xf32>, vector<16x32xf32> -> vector<16x32xf32>
    %117 = arith.addf %112, %116 : vector<16x32xf32>
    %118 = vector.extract_strided_slice %18 {offsets = [0, 640], sizes = [32, 32], strides = [1, 1]} : vector<32x800xf32> to vector<32x32xf32>
    %c20 = arith.constant 20 : index
    %c0_79 = arith.constant 0 : index
    %c0_80 = arith.constant 0 : index
    %119 = vector.load %arg4[%c20, %c0_79, %c0_80] : memref<25x16x32xf32, #tpu.memory_space<vmem>>, vector<1x16x32xf32>
    %120 = vector.shape_cast %119 : vector<1x16x32xf32> to vector<16x32xf32>
    %cst_81 = arith.constant dense<0.000000e+00> : vector<16x32xf32>
    %121 = tpu.matmul %120, %118, %cst_81 {dimension_numbers = #tpu.dot_dimension_numbers<[1], [0], [0], [1], [0, 0, 1, 1], [], []>} : vector<16x32xf32>, vector<32x32xf32>, vector<16x32xf32> -> vector<16x32xf32>
    %122 = arith.addf %117, %121 : vector<16x32xf32>
    %123 = vector.extract_strided_slice %18 {offsets = [0, 672], sizes = [32, 32], strides = [1, 1]} : vector<32x800xf32> to vector<32x32xf32>
    %c21 = arith.constant 21 : index
    %c0_82 = arith.constant 0 : index
    %c0_83 = arith.constant 0 : index
    %124 = vector.load %arg4[%c21, %c0_82, %c0_83] : memref<25x16x32xf32, #tpu.memory_space<vmem>>, vector<1x16x32xf32>
    %125 = vector.shape_cast %124 : vector<1x16x32xf32> to vector<16x32xf32>
    %cst_84 = arith.constant dense<0.000000e+00> : vector<16x32xf32>
    %126 = tpu.matmul %125, %123, %cst_84 {dimension_numbers = #tpu.dot_dimension_numbers<[1], [0], [0], [1], [0, 0, 1, 1], [], []>} : vector<16x32xf32>, vector<32x32xf32>, vector<16x32xf32> -> vector<16x32xf32>
    %127 = arith.addf %122, %126 : vector<16x32xf32>
    %128 = vector.extract_strided_slice %18 {offsets = [0, 704], sizes = [32, 32], strides = [1, 1]} : vector<32x800xf32> to vector<32x32xf32>
    %c22 = arith.constant 22 : index
    %c0_85 = arith.constant 0 : index
    %c0_86 = arith.constant 0 : index
    %129 = vector.load %arg4[%c22, %c0_85, %c0_86] : memref<25x16x32xf32, #tpu.memory_space<vmem>>, vector<1x16x32xf32>
    %130 = vector.shape_cast %129 : vector<1x16x32xf32> to vector<16x32xf32>
    %cst_87 = arith.constant dense<0.000000e+00> : vector<16x32xf32>
    %131 = tpu.matmul %130, %128, %cst_87 {dimension_numbers = #tpu.dot_dimension_numbers<[1], [0], [0], [1], [0, 0, 1, 1], [], []>} : vector<16x32xf32>, vector<32x32xf32>, vector<16x32xf32> -> vector<16x32xf32>
    %132 = arith.addf %127, %131 : vector<16x32xf32>
    %133 = vector.extract_strided_slice %18 {offsets = [0, 736], sizes = [32, 32], strides = [1, 1]} : vector<32x800xf32> to vector<32x32xf32>
    %c23 = arith.constant 23 : index
    %c0_88 = arith.constant 0 : index
    %c0_89 = arith.constant 0 : index
    %134 = vector.load %arg4[%c23, %c0_88, %c0_89] : memref<25x16x32xf32, #tpu.memory_space<vmem>>, vector<1x16x32xf32>
    %135 = vector.shape_cast %134 : vector<1x16x32xf32> to vector<16x32xf32>
    %cst_90 = arith.constant dense<0.000000e+00> : vector<16x32xf32>
    %136 = tpu.matmul %135, %133, %cst_90 {dimension_numbers = #tpu.dot_dimension_numbers<[1], [0], [0], [1], [0, 0, 1, 1], [], []>} : vector<16x32xf32>, vector<32x32xf32>, vector<16x32xf32> -> vector<16x32xf32>
    %137 = arith.addf %132, %136 : vector<16x32xf32>
    %138 = vector.extract_strided_slice %18 {offsets = [0, 768], sizes = [32, 32], strides = [1, 1]} : vector<32x800xf32> to vector<32x32xf32>
    %c24 = arith.constant 24 : index
    %c0_91 = arith.constant 0 : index
    %c0_92 = arith.constant 0 : index
    %139 = vector.load %arg4[%c24, %c0_91, %c0_92] : memref<25x16x32xf32, #tpu.memory_space<vmem>>, vector<1x16x32xf32>
    %140 = vector.shape_cast %139 : vector<1x16x32xf32> to vector<16x32xf32>
    %cst_93 = arith.constant dense<0.000000e+00> : vector<16x32xf32>
    %141 = tpu.matmul %140, %138, %cst_93 {dimension_numbers = #tpu.dot_dimension_numbers<[1], [0], [0], [1], [0, 0, 1, 1], [], []>} : vector<16x32xf32>, vector<32x32xf32>, vector<16x32xf32> -> vector<16x32xf32>
    %142 = arith.addf %137, %141 : vector<16x32xf32>
    %c0_94 = arith.constant 0 : index
    %c0_95 = arith.constant 0 : index
    %143 = vector.load %arg5[%c0_94, %c0_95] : memref<16x1xf32, #tpu.memory_space<vmem>>, vector<16x1xf32>
    %144 = vector.broadcast %143 : vector<16x1xf32> to vector<16x32xf32>
    %145 = arith.addf %142, %144 : vector<16x32xf32>
    %cst_96 = arith.constant 0.000000e+00 : f32
    %146 = vector.broadcast %cst_96 : f32 to vector<16x32xf32>
    %147 = arith.maximumf %145, %146 : vector<16x32xf32>
    %c0_97 = arith.constant 0 : index
    %c0_98 = arith.constant 0 : index
    %148 = vector.load %arg6[%c0_97, %c0_98] : memref<2x16xf32, #tpu.memory_space<vmem>>, vector<2x16xf32>
    %cst_99 = arith.constant dense<0.000000e+00> : vector<2x32xf32>
    %149 = tpu.matmul %148, %147, %cst_99 {dimension_numbers = #tpu.dot_dimension_numbers<[1], [0], [0], [1], [0, 0, 1, 1], [], []>} : vector<2x16xf32>, vector<16x32xf32>, vector<2x32xf32> -> vector<2x32xf32>
    %c0_100 = arith.constant 0 : index
    %c0_101 = arith.constant 0 : index
    %150 = vector.load %arg7[%c0_100, %c0_101] : memref<2x1xf32, #tpu.memory_space<vmem>>, vector<2x1xf32>
    %151 = vector.broadcast %150 : vector<2x1xf32> to vector<2x32xf32>
    %152 = arith.addf %149, %151 : vector<2x32xf32>
    %153 = vector.extract_strided_slice %152 {offsets = [0, 0], sizes = [1, 32], strides = [1, 1]} : vector<2x32xf32> to vector<1x32xf32>
    %154 = vector.extract_strided_slice %152 {offsets = [1, 0], sizes = [1, 32], strides = [1, 1]} : vector<2x32xf32> to vector<1x32xf32>
    %155 = arith.maximumf %153, %154 : vector<1x32xf32>
    %156 = arith.subf %153, %155 : vector<1x32xf32>
    %157 = math.exp %156 : vector<1x32xf32>
    %158 = arith.subf %154, %155 : vector<1x32xf32>
    %159 = math.exp %158 : vector<1x32xf32>
    %160 = arith.addf %157, %159 : vector<1x32xf32>
    %161 = tpu.reciprocal %160 : vector<1x32xf32> -> vector<1x32xf32>
    %162 = arith.mulf %157, %161 : vector<1x32xf32>
    %163 = arith.mulf %159, %161 : vector<1x32xf32>
    %164 = tpu.concatenate %162, %163 in 0 : vector<1x32xf32>, vector<1x32xf32> -> vector<2x32xf32>
    %c0_102 = arith.constant 0 : index
    %c0_103 = arith.constant 0 : index
    %165 = vector.load %arg8[%c0_102, %c0_103] : memref<2x32xf32, #tpu.memory_space<vmem>>, vector<2x32xf32>
    tpu.vector_store %arg8[%c0_102, %c0_103], %164 {strides = array<i32>} : memref<2x32xf32, #tpu.memory_space<vmem>>, vector<2x32xf32>,
    return
  }
  func.func @transform_0(%arg0: i32) -> (i32, i32, i32) {
    %c0_i32 = arith.constant 0 : i32
    %c0_i32_0 = arith.constant 0 : i32
    %c0_i32_1 = arith.constant 0 : i32
    return %c0_i32, %c0_i32_0, %arg0 : i32, i32, i32
  }
  func.func @transform_1(%arg0: i32) -> (i32, i32) {
    %c0_i32 = arith.constant 0 : i32
    %c0_i32_0 = arith.constant 0 : i32
    %c0_i32_1 = arith.constant 0 : i32
    return %c0_i32, %c0_i32_0 : i32, i32
  }
  func.func @transform_2(%arg0: i32) -> (i32, i32) {
    %c0_i32 = arith.constant 0 : i32
    %c0_i32_0 = arith.constant 0 : i32
    %c0_i32_1 = arith.constant 0 : i32
    return %c0_i32, %c0_i32_0 : i32, i32
  }
  func.func @transform_3(%arg0: i32) -> (i32, i32, i32) {
    %c0_i32 = arith.constant 0 : i32
    %c0_i32_0 = arith.constant 0 : i32
    %c0_i32_1 = arith.constant 0 : i32
    %c0_i32_2 = arith.constant 0 : i32
    return %c0_i32, %c0_i32_0, %c0_i32_1 : i32, i32, i32
  }
  func.func @transform_4(%arg0: i32) -> (i32, i32) {
    %c0_i32 = arith.constant 0 : i32
    %c0_i32_0 = arith.constant 0 : i32
    %c0_i32_1 = arith.constant 0 : i32
    return %c0_i32, %c0_i32_0 : i32, i32
  }
  func.func @transform_5(%arg0: i32) -> (i32, i32) {
    %c0_i32 = arith.constant 0 : i32
    %c0_i32_0 = arith.constant 0 : i32
    %c0_i32_1 = arith.constant 0 : i32
    return %c0_i32, %c0_i32_0 : i32, i32
  }
  func.func @transform_6(%arg0: i32) -> (i32, i32) {
    %c0_i32 = arith.constant 0 : i32
    %c0_i32_0 = arith.constant 0 : i32
    %c0_i32_1 = arith.constant 0 : i32
    return %c0_i32, %c0_i32_0 : i32, i32
  }
  func.func @transform_7(%arg0: i32) -> (i32, i32) {
    %c0_i32 = arith.constant 0 : i32
    %c0_i32_0 = arith.constant 0 : i32
    return %c0_i32, %arg0 : i32, i32
  }
}

</mosaic_0001>

<bundles_post_ra>
// kernel: mymodel_forward.1
= control target key start
LH: loop header
LB: loop body
LE: loop exit
PB: predicated region body
PF: predicated region fallthrough
CT: control target
= control target key end

     0   :  { %v7141_v3 = vmov 0.0   ;;  %vm72_vm0 = vcmask 392192   ;;  %vm1779_vm1 = vcmask 261120   ;;  %s5749_s16 = smov 64   ;;  %s5750_s17 = smov 32   ;;  %vm5752_vm2 = vmmov 0   ;;  %s7133_s0 = inlined_call_operand.vmem [shape: f32[4,48,800], index: 0, kind: input, shape index: {}]   ;;  %s7134_s1 = inlined_call_operand.vmem [shape: f32[32,48], index: 1, kind: input, shape index: {}]   ;;  %s7135_s2 = inlined_call_operand.vmem [shape: f32[32,1], index: 2, kind: input, shape index: {}]   ;;  %s7136_s3 = inlined_call_operand.vmem [shape: f32[25,16,32], index: 3, kind: input, shape index: {}]   ;;  %s7137_s4 = inlined_call_operand.vmem [shape: f32[16,1], index: 4, kind: input, shape index: {}]   ;;  %s7138_s6 = inlined_call_operand.vmem [shape: f32[2,1], index: 6, kind: input, shape index: {}]   ;;  %s7139_s5 = inlined_call_operand.vmem [shape: f32[2,16], index: 5, kind: input, shape index: {}]   ;;  %s7140_s7 = inlined_call_operand.vmem [shape: f32[2,32], index: 7, kind: output, shape index: {}]  }
   0x1   :  { %v31_v0 = vld [vmem:[%s7133_s0 + $0x8] sm:$0xff]  ;;  %v38_v1 = vld [vmem:[%s7133_s0 + $0x40] sm:$0xff]  ;;  %149 = vmatprep.mubr.f32.mxu1 %v7141_v3  ;;  %1479 = vmatprep.mubr.f32.mxu0 %v7141_v3  ;;  %v37_v5 = vld [vmem:[%s7133_s0 + $0x38] sm:$0xff]  ;;  %vm4167_vm3 = vcmask 130048   ;;  %vm4264_vm4 = vcmask 1040384   ;;  %vm4266_vm5 = vcmask 254976  }
   0x2   :  { %v30_v2 = vld [vmem:[%s7133_s0] sm:$0xff]  ;;  %v5108_v4 = vpack.c.bf16 %v38_v1, %v31_v0  ;;  %v45_v6 = vld [vmem:[%s7133_s0 + $0x78] sm:$0xff]  ;;  %v52_v7 = vld [vmem:[%s7133_s0 + $0xb0] sm:$0xff] }
   0x3   :  { %v5110_v8 = vpack.c.bf16 %v37_v5, %v30_v2  ;;  %v5112_v9 = vpack.c.bf16 %v52_v7, %v45_v6  ;;  %v44_v10 = vld [vmem:[%s7133_s0 + $0x70] sm:$0xff]  ;;  %v51_v11 = vld [vmem:[%s7133_s0 + $0xa8] sm:$0xff]  ;;  %v66_v13 = vld [vmem:[%s7133_s0 + $0x120] sm:$0xff] }
   0x4   :  { %v59_v12 = vld [vmem:[%s7133_s0 + $0xe8] sm:$0xff]  ;;  %5109 = vmatprep.subr.bf16.mxu1 %v5108_v4  ;;  %v5114_v14 = vpack.c.bf16 %v51_v11, %v44_v10  ;;  %v58_v16 = vld [vmem:[%s7133_s0 + $0xe0] sm:$0xff]  ;;  %v65_v17 = vld [vmem:[%s7133_s0 + $0x118] sm:$0xff] }
   0x5   :  { %5111 = vmatpush1.bf16.msra.mxu1 %v5110_v8  ;;  %v5116_v15 = vpack.c.bf16 %v66_v13, %v59_v12  ;;  %v33_v18 = vld [vmem:[%s7133_s0 + $0x18] sm:$0xff]  ;;  %v40_v19 = vld [vmem:[%s7133_s0 + $0x50] sm:$0xff]  ;;  %v5118_v20 = vpack.c.bf16 %v65_v17, %v58_v16  ;;  %v39_v23 = vld [vmem:[%s7133_s0 + $0x48] sm:$0xff] }
   0x6   :  { %5113 = vmatprep.subr.bf16.mxu1 %v5112_v9  ;;  %v5120_v21 = vpack.c.bf16 %v40_v19, %v33_v18  ;;  %v32_v22 = vld [vmem:[%s7133_s0 + $0x10] sm:$0xff]  ;;  %v47_v24 = vld [vmem:[%s7133_s0 + $0x88] sm:$0xff]  ;;  %v54_v25 = vld [vmem:[%s7133_s0 + $0xc0] sm:$0xff] }
   0x7   :  { %v5852_v26 = vld [vmem:[%s7134_s1] sm:$0xff]  ;;  %v5122_v27 = vpack.c.bf16 %v39_v23, %v32_v22  ;;  %v5124_v28 = vpack.c.bf16 %v54_v25, %v47_v24  ;;  %v53_v30 = vld [vmem:[%s7133_s0 + $0xb8] sm:$0xff]  ;;  %v68_v32 = vld [vmem:[%s7133_s0 + $0x130] sm:$0xff] }
   0x8   :  { %v46_v29 = vld [vmem:[%s7133_s0 + $0x80] sm:$0xff]  ;;  %v61_v31 = vld [vmem:[%s7133_s0 + $0xf8] sm:$0xff]  ;;  %v5872_v33 = vld [vmem:[%s7134_s1 + $0x8] sm:$0xff] }
   0x9   :  { %5115 = vmatpush1.bf16.msra.mxu1 %v5114_v14  ;;  %v5126_v34 = vpack.c.bf16 %v53_v30, %v46_v29  ;;  %v5128_v35 = vpack.c.bf16 %v68_v32, %v61_v31  ;;  %v60_v36 = vld [vmem:[%s7133_s0 + $0xf0] sm:$0xff]  ;;  %v67_v37 = vld [vmem:[%s7133_s0 + $0x128] sm:$0xff]  ;;  %v42_v39 = vld [vmem:[%s7133_s0 + $0x60] sm:$0xff] }
   0xa   :  { %5117 = vmatprep.subr.bf16.mxu1 %v5116_v15  ;;  %v35_v38 = vld [vmem:[%s7133_s0 + $0x28] sm:$0xff]  ;;  %v5892_v40 = vld [vmem:[%s7134_s1 + $0x10] sm:$0xff]  ;;  %v5130_v41 = vpack.c.bf16 %v67_v37, %v60_v36  ;;  %v5900_v43 = vld [vmem:[%s7134_s1 + $0x18] sm:$0xff] }
   0xb   :  { %v5132_v42 = vpack.c.bf16 %v42_v39, %v35_v38  ;;  %v34_v44 = vld [vmem:[%s7133_s0 + $0x20] sm:$0xff]  ;;  %v41_v45 = vld [vmem:[%s7133_s0 + $0x58] sm:$0xff]  ;;  %v56_v47 = vld [vmem:[%s7133_s0 + $0xd0] sm:$0xff] }
   0xc   :  { %v49_v46 = vld [vmem:[%s7133_s0 + $0x98] sm:$0xff]  ;;  %v5134_v48 = vpack.c.bf16 %v41_v45, %v34_v44  ;;  %v48_v50 = vld [vmem:[%s7133_s0 + $0x90] sm:$0xff]  ;;  %v55_v51 = vld [vmem:[%s7133_s0 + $0xc8] sm:$0xff] }
   0xd   :  { %5119 = vmatpush1.bf16.msra.mxu1 %v5118_v20  ;;  %v5136_v49 = vpack.c.bf16 %v56_v47, %v49_v46  ;;  %v63_v52 = vld [vmem:[%s7133_s0 + $0x108] sm:$0xff]  ;;  %v70_v53 = vld [vmem:[%s7133_s0 + $0x140] sm:$0xff]  ;;  %v5138_v54 = vpack.c.bf16 %v55_v51, %v48_v50  ;;  %v69_v57 = vld [vmem:[%s7133_s0 + $0x138] sm:$0xff] }
   0xe   :  { %5121 = vmatprep.subr.bf16.mxu1 %v5120_v21  ;;  %v5140_v55 = vpack.c.bf16 %v70_v53, %v63_v52  ;;  %v62_v56 = vld [vmem:[%s7133_s0 + $0x100] sm:$0xff]  ;;  %v36_v58 = vld [vmem:[%s7133_s0 + $0x30] sm:$0xff]  ;;  %v43_v59 = vld [vmem:[%s7133_s0 + $0x68] sm:$0xff] }
   0xf   :  { %v4407_v60 = vld [vmem:[%s7133_s0 + $0x408] sm:$0xff]  ;;  %v4414_v61 = vld [vmem:[%s7133_s0 + $0x440] sm:$0xff]  ;;  %v4413_v63 = vld [vmem:[%s7133_s0 + $0x438] sm:$0xff]  ;;  %v5142_v0 = vpack.c.bf16 %v69_v57, %v62_v56  ;;  %v5144_v4 = vpack.c.bf16 %v43_v59, %v36_v58 }
  0x10   :  { %4272 = vmatmul.mubr.msk.f32.vlgmr.msra.gmra.mrb[0].mxu1 %vm72_vm0, %v5852_v26  ;;  %v4406_v62 = vld [vmem:[%s7133_s0 + $0x400] sm:$0xff]  ;;  %v5264_v1 = vpack.c.bf16 %v4414_v61, %v4407_v60  ;;  %v4421_v5 = vld [vmem:[%s7133_s0 + $0x478] sm:$0xff]  ;;  %v4428_v6 = vld [vmem:[%s7133_s0 + $0x4b0] sm:$0xff] }
  0x11   :  { %155 = vmatprep.mubr.f32.mxu1 %v7141_v3  ;;  %5123 = vmatpush1.bf16.msra.mxu1 %v5122_v27  ;;  %v5266_v2 = vpack.c.bf16 %v4413_v63, %v4406_v62  ;;  %v5268_v7 = vpack.c.bf16 %v4428_v6, %v4421_v5  ;;  %v4420_v8 = vld [vmem:[%s7133_s0 + $0x470] sm:$0xff]  ;;  %v4427_v9 = vld [vmem:[%s7133_s0 + $0x4a8] sm:$0xff]  ;;  %v4442_v12 = vld [vmem:[%s7133_s0 + $0x520] sm:$0xff] }
  0x12   :  { %5125 = vmatprep.subr.bf16.mxu1 %v5124_v28  ;;  %5265 = vmatprep.subr.bf16.mxu0 %v5264_v1  ;;  %v5270_v10 = vpack.c.bf16 %v4427_v9, %v4420_v8  ;;  %v4435_v11 = vld [vmem:[%s7133_s0 + $0x4e8] sm:$0xff]  ;;  %v4434_v13 = vld [vmem:[%s7133_s0 + $0x4e0] sm:$0xff]  ;;  %v4441_v15 = vld [vmem:[%s7133_s0 + $0x518] sm:$0xff] }
  0x13   :  { %5267 = vmatpush1.bf16.msra.mxu0 %v5266_v2  ;;  %v5272_v14 = vpack.c.bf16 %v4442_v12, %v4435_v11  ;;  %v50_v16 = vld [vmem:[%s7133_s0 + $0xa0] sm:$0xff]  ;;  %v57_v17 = vld [vmem:[%s7133_s0 + $0xd8] sm:$0xff]  ;;  %v5274_v18 = vpack.c.bf16 %v4441_v15, %v4434_v13  ;;  %v64_v20 = vld [vmem:[%s7133_s0 + $0x110] sm:$0xff] }
  0x14   :  { %4273 = vmatmul.mubr.msk.f32.gmra.mrb[2].mxu1 %vm72_vm0, %v5872_v33  ;;  %5269 = vmatprep.subr.bf16.mxu0 %v5268_v7  ;;  %v5148_v19 = vpack.c.bf16 %v57_v17, %v50_v16  ;;  %v71_v21 = vld [vmem:[%s7133_s0 + $0x148] sm:$0xff]  ;;  %v4410_v22 = vld [vmem:[%s7133_s0 + $0x420] sm:$0xff]  ;;  %v4417_v23 = vld [vmem:[%s7133_s0 + $0x458] sm:$0xff] }
  0x15   :  { %161 = vmatprep.mubr.f32.mxu1 %v7141_v3  ;;  %5127 = vmatpush1.bf16.msra.mxu1 %v5126_v34  ;;  %v5288_v24 = vpack.c.bf16 %v4417_v23, %v4410_v22  ;;  %v4424_v25 = vld [vmem:[%s7133_s0 + $0x490] sm:$0xff]  ;;  %v4431_v27 = vld [vmem:[%s7133_s0 + $0x4c8] sm:$0xff]  ;;  %v5152_v28 = vpack.c.bf16 %v71_v21, %v64_v20  ;;  %v4289_v29 = vld [vmem:[%s7133_s0 + $0x158] sm:$0xff] }
  0x16   :  { %5129 = vmatprep.subr.bf16.mxu1 %v5128_v35  ;;  %v4296_v30 = vld [vmem:[%s7133_s0 + $0x190] sm:$0xff]  ;;  %v5292_v31 = vpack.c.bf16 %v4431_v27, %v4424_v25  ;;  %v4438_v32 = vld [vmem:[%s7133_s0 + $0x500] sm:$0xff]  ;;  %v4445_v34 = vld [vmem:[%s7133_s0 + $0x538] sm:$0xff] }
  0x17   :  { %5271 = vmatpush1.bf16.msra.mxu0 %v5270_v10  ;;  %v5156_v35 = vpack.c.bf16 %v4296_v30, %v4289_v29  ;;  %v5296_v36 = vpack.c.bf16 %v4445_v34, %v4438_v32  ;;  %v4288_v37 = vld [vmem:[%s7133_s0 + $0x150] sm:$0xff]  ;;  %v4295_v38 = vld [vmem:[%s7133_s0 + $0x188] sm:$0xff]  ;;  %v4302_v45 = vld [vmem:[%s7133_s0 + $0x1c0] sm:$0xff] }
  0x18   :  { %4274 = vmatmul.mubr.msk.f32.gmra.mrb[4].mxu1 %vm72_vm0, %v5892_v40  ;;  %5273 = vmatprep.subr.bf16.mxu0 %v5272_v14  ;;  %v4303_v39 = vld [vmem:[%s7133_s0 + $0x1c8] sm:$0xff]  ;;  %v4309_v46 = vld [vmem:[%s7133_s0 + $0x1f8] sm:$0xff]  ;;  %v4316_v51 = vld [vmem:[%s7133_s0 + $0x230] sm:$0xff] }
  0x19   :  { %167 = vmatprep.mubr.f32.mxu1 %v7141_v3  ;;  %5131 = vmatpush1.bf16.msra.mxu1 %v5130_v41  ;;  %v4310_v41 = vld [vmem:[%s7133_s0 + $0x200] sm:$0xff]  ;;  %v4317_v47 = vld [vmem:[%s7133_s0 + $0x238] sm:$0xff]  ;;  %v4323_v52 = vld [vmem:[%s7133_s0 + $0x268] sm:$0xff] }
  0x1a   :  { %5133 = vmatprep.subr.bf16.mxu1 %v5132_v42  ;;  %v5158_v42 = vpack.c.bf16 %v4295_v38, %v4288_v37  ;;  %v5160_v44 = vpack.c.bf16 %v4310_v41, %v4303_v39  ;;  %v4291_v53 = vld [vmem:[%s7133_s0 + $0x168] sm:$0xff]  ;;  %v4290_v57 = vld [vmem:[%s7133_s0 + $0x160] sm:$0xff]  ;;  %v4297_v58 = vld [vmem:[%s7133_s0 + $0x198] sm:$0xff]  ;;  %v5747_v39 = vmov 0  }
  0x1b   :  { %5275 = vmatpush1.bf16.msra.mxu0 %v5274_v18  ;;  %v4305_v59 = vld [vmem:[%s7133_s0 + $0x1d8] sm:$0xff]  ;;  %v4312_v60 = vld [vmem:[%s7133_s0 + $0x210] sm:$0xff]  ;;  %v5170_v61 = vpack.c.bf16 %v4297_v58, %v4290_v57  ;;  %v4319_v1 = vld [vmem:[%s7133_s0 + $0x248] sm:$0xff]  ;;  %5558 = vset.pattern.permute.xlu0 %v5747_v39 }
  0x1c   :  { %4275 = vmatmul.mubr.msk.f32.gmra.mrb[6].mxu1 %vm72_vm0, %v5900_v43  ;;  %5289 = vmatprep.subr.bf16.mxu0 %v5288_v24  ;;  %v5172_v62 = vpack.c.bf16 %v4312_v60, %v4305_v59  ;;  %v4304_v63 = vld [vmem:[%s7133_s0 + $0x1d0] sm:$0xff]  ;;  %v4326_v2 = vld [vmem:[%s7133_s0 + $0x280] sm:$0xff]  ;;  %v4325_v7 = vld [vmem:[%s7133_s0 + $0x278] sm:$0xff] }
  0x1d   :  { %238 = vmatprep.mubr.f32.mxu1 %v7141_v3  ;;  %v5176_v5 = vpack.c.bf16 %v4326_v2, %v4319_v1  ;;  %v4318_v6 = vld [vmem:[%s7133_s0 + $0x240] sm:$0xff]  ;;  %v4293_v8 = vld [vmem:[%s7133_s0 + $0x178] sm:$0xff]  ;;  %v4300_v9 = vld [vmem:[%s7133_s0 + $0x1b0] sm:$0xff]  ;;  %5559 = vset.pattern.permute.xlu1 %v5747_v39 }
  0x1e   :  { %4450 = vmatmul.mubr.msk.f32.vlgmr.msra.gmra.mrb[0].mxu0 %vm72_vm0, %v5852_v26  ;;  %v5178_v10 = vpack.c.bf16 %v4325_v7, %v4318_v6  ;;  %v5180_v11 = vpack.c.bf16 %v4300_v9, %v4293_v8  ;;  %v4292_v12 = vld [vmem:[%s7133_s0 + $0x170] sm:$0xff]  ;;  %v4299_v13 = vld [vmem:[%s7133_s0 + $0x1a8] sm:$0xff]  ;;  %v4314_v15 = vld [vmem:[%s7133_s0 + $0x220] sm:$0xff] }
  0x1f   :  { %1485 = vmatprep.mubr.f32.mxu0 %v7141_v3  ;;  %5291 = vmatpush3.bf16.msra.mxu0 %v5288_v24  ;;  %v4307_v14 = vld [vmem:[%s7133_s0 + $0x1e8] sm:$0xff]  ;;  %v5182_v16 = vpack.c.bf16 %v4299_v13, %v4292_v12  ;;  %v4306_v18 = vld [vmem:[%s7133_s0 + $0x1e0] sm:$0xff]  ;;  %v4321_v20 = vld [vmem:[%s7133_s0 + $0x258] sm:$0xff] }
  0x20   :  { %4276 = vmatmul.mubr.msk.f32.vlgmr.msra.gmra.mrb[8].mxu1 %vm72_vm0, %v5852_v26  ;;  %5293 = vmatprep.subr.bf16.mxu0 %v5292_v31  ;;  %v5184_v17 = vpack.c.bf16 %v4314_v15, %v4307_v14  ;;  %v4328_v21 = vld [vmem:[%s7133_s0 + $0x290] sm:$0xff]  ;;  %v4327_v25 = vld [vmem:[%s7133_s0 + $0x288] sm:$0xff]  ;;  %v4294_v27 = vld [vmem:[%s7133_s0 + $0x180] sm:$0xff] }
  0x21   :  { %244 = vmatprep.mubr.f32.mxu1 %v7141_v3  ;;  %5135 = vmatpush1.bf16.msra.mxu1 %v5134_v48  ;;  %v4324_v48 = vld [vmem:[%s7133_s0 + $0x270] sm:$0xff]  ;;  %v5188_v23 = vpack.c.bf16 %v4328_v21, %v4321_v20  ;;  %v4315_v32 = vld [vmem:[%s7133_s0 + $0x228] sm:$0xff]  ;;  %v1706_v37 = vld [vmem:[%s7135_s2] sm:$0xff] }
  0x22   :  { %5137 = vmatprep.subr.bf16.mxu1 %v5136_v49  ;;  %4451 = vmatmul.mubr.msk.f32.gmra.mrb[2].mxu0 %vm72_vm0, %v5872_v33  ;;  %v5162_v49 = vpack.c.bf16 %v4309_v46, %v4302_v45  ;;  %v5164_v50 = vpack.c.bf16 %v4324_v48, %v4317_v47  ;;  %v4320_v24 = vld [vmem:[%s7133_s0 + $0x250] sm:$0xff]  ;;  %v4347_v41 = vld [vmem:[%s7133_s0 + $0x2a8] sm:$0xff]  ;;  %v4346_v47 = vld [vmem:[%s7133_s0 + $0x2a0] sm:$0xff] }
  0x23   :  { %1491 = vmatprep.mubr.f32.mxu0 %v7141_v3  ;;  %5295 = vmatpush3.bf16.msra.mxu0 %v5292_v31  ;;  %v5190_v29 = vpack.c.bf16 %v4327_v25, %v4320_v24  ;;  %v4308_v31 = vld [vmem:[%s7133_s0 + $0x1f0] sm:$0xff]  ;;  %v4353_v48 = vld [vmem:[%s7133_s0 + $0x2d8] sm:$0xff]  ;;  %v4382_v57 = vld [vmem:[%s7133_s0 + $0x3c0] sm:$0xff] }
  0x24   :  { %4277 = vmatmul.mubr.msk.f32.gmra.mrb[10].mxu1 %vm72_vm0, %v5872_v33  ;;  %5297 = vmatprep.subr.bf16.mxu0 %v5296_v36  ;;  %v5196_v34 = vpack.c.bf16 %v4315_v32, %v4308_v31  ;;  %v1708_v46 = vld [vmem:[%s7135_s2 + $0x10] sm:$0xff]  ;;  %v4374_v60 = vld [vmem:[%s7133_s0 + $0x380] sm:$0xff] }
  0x25   :  { %250 = vmatprep.mubr.f32.mxu1 %v7141_v3  ;;  %5139 = vmatpush1.bf16.msra.mxu1 %v5138_v54  ;;  %v4298_v54 = vld [vmem:[%s7133_s0 + $0x1a0] sm:$0xff]  ;;  %v4348_v2 = vld [vmem:[%s7133_s0 + $0x2b0] sm:$0xff] }
  0x26   :  { %5141 = vmatprep.subr.bf16.mxu1 %v5140_v55  ;;  %4452 = vmatmul.mubr.msk.f32.gmra.mrb[4].mxu0 %vm72_vm0, %v5892_v40  ;;  %v5166_v55 = vpack.c.bf16 %v4323_v52, %v4316_v51  ;;  %v5168_v56 = vpack.c.bf16 %v4298_v54, %v4291_v53  ;;  %v1709_v51 = vld [vmem:[%s7135_s2 + $0x18] sm:$0xff]  ;;  %v5206_v52 = vpack.c.bf16 %v4353_v48, %v4346_v47  ;;  %v4360_v54 = vld [vmem:[%s7133_s0 + $0x310] sm:$0xff]  ;;  %v4370_v6 = vld [vmem:[%s7133_s0 + $0x360] sm:$0xff] }
  0x27   :  { %1497 = vmatprep.mubr.f32.mxu0 %v7141_v3  ;;  %5299 = vmatpush3.bf16.msra.mxu0 %v5296_v36  ;;  %v4329_v36 = vld [vmem:[%s7133_s0 + $0x298] sm:$0xff]  ;;  %v4362_v9 = vld [vmem:[%s7133_s0 + $0x320] sm:$0xff]  ;;  %v4384_v12 = vld [vmem:[%s7133_s0 + $0x3d0] sm:$0xff] }
  0x28   :  { %4278 = vmatmul.mubr.msk.f32.gmra.mrb[12].mxu1 %vm72_vm0, %v5892_v40  ;;  %1712 = vperm.xlu0 %5558, %v1706_v37   ;;  %v4376_v15 = vld [vmem:[%s7133_s0 + $0x390] sm:$0xff]  ;;  %v4350_v21 = vld [vmem:[%s7133_s0 + $0x2c0] sm:$0xff]  ;;  %v4387_v47 = vld [vmem:[%s7133_s0 + $0x3e8] sm:$0xff] }
  0x29   :  { %256 = vmatprep.mubr.f32.mxu1 %v7141_v3  ;;  %5143 = vmatpush1.bf16.msra.mxu1 %v5142_v0  ;;  %v4311_v0 = vld [vmem:[%s7133_s0 + $0x208] sm:$0xff]  ;;  %v4372_v24 = vld [vmem:[%s7133_s0 + $0x370] sm:$0xff]  ;;  %v4386_v31 = vld [vmem:[%s7133_s0 + $0x3e0] sm:$0xff] }
  0x2a   :  { %5145 = vmatprep.subr.bf16.mxu1 %v5144_v4  ;;  %4453 = vmatmul.mubr.msk.f32.gmra.mrb[6].mxu0 %vm72_vm0, %v5900_v43  ;;  %v4352_v37 = vld [vmem:[%s7133_s0 + $0x2d0] sm:$0xff] }
  0x2b   :  { %4820 = vmatprep.mubr.msk.f32.mxu0 %vm72_vm0, %v5852_v26  ;;  %1722 = vperm.xlu1 %5559, %v1708_v46   ;;  %v4380_v46 = vld [vmem:[%s7133_s0 + $0x3b0] sm:$0xff] }
  0x2c   :  { %4279 = vmatmul.mubr.msk.f32.gmra.mrb[14].mxu1 %vm72_vm0, %v5900_v43  ;;  %v5248_v48 = vpack.c.bf16 %v4387_v47, %v4380_v46 }
  0x2d   :  { %327 = vmatprep.mubr.f32.mxu1 %v7141_v3 }
  0x2e   :  { %4821 = vmatmul.mubr.msk.f32.vlgmr.msra.gmra.mrb[8].mxu0 %vm72_vm0, %v5872_v33 }
  0x2f   :  { %4823 = vmatprep.mubr.msk.f32.mxu0 %vm72_vm0, %v5892_v40  ;;  %1727 = vperm.xlu1 %5559, %v1709_v51  }
  0x30   :  { %4280 = vmatmul.mubr.msk.f32.vlgmr.msra.gmra.mrb[16].mxu1 %vm72_vm0, %v5852_v26 }
  0x31   :  { %333 = vmatprep.mubr.f32.mxu1 %v7141_v3  ;;  %5147 = vmatpush3.bf16.msra.mxu1 %v5144_v4  ;;  %v5174_v4 = vpack.c.bf16 %v4311_v0, %v4304_v63  ;;  %v4356_v63 = vld [vmem:[%s7133_s0 + $0x2f0] sm:$0xff] }
  0x32   :  { %5149 = vmatprep.subr.bf16.mxu1 %v5148_v19  ;;  %4824 = vmatmul.mubr.msk.f32.gmra.mrb[10].mxu0 %vm72_vm0, %v5900_v43 }
  0x34   :  { %4281 = vmatmul.mubr.msk.f32.gmra.mrb[18].mxu1 %vm72_vm0, %v5872_v33 }
  0x35   :  { %339 = vmatprep.mubr.f32.mxu1 %v7141_v3  ;;  %5151 = vmatpush3.bf16.msra.mxu1 %v5148_v19  ;;  %v4313_v19 = vld [vmem:[%s7133_s0 + $0x218] sm:$0xff] }
  0x36   :  { %5153 = vmatprep.subr.bf16.mxu1 %v5152_v28  ;;  %v5186_v22 = vpack.c.bf16 %v4313_v19, %v4306_v18  ;;  %v4358_v18 = vld [vmem:[%s7133_s0 + $0x300] sm:$0xff] }
  0x38   :  { %4282 = vmatmul.mubr.msk.f32.gmra.mrb[20].mxu1 %vm72_vm0, %v5892_v40 }
  0x39   :  { %345 = vmatprep.mubr.f32.mxu1 %v7141_v3  ;;  %5155 = vmatpush3.bf16.msra.mxu1 %v5152_v28  ;;  %v4301_v28 = vld [vmem:[%s7133_s0 + $0x1b8] sm:$0xff] }
  0x3a   :  { %5157 = vmatprep.subr.bf16.mxu1 %v5156_v35  ;;  %v5192_v30 = vpack.c.bf16 %v4301_v28, %v4294_v27  ;;  %v4322_v35 = vld [vmem:[%s7133_s0 + $0x260] sm:$0xff]  ;;  %v4364_v28 = vld [vmem:[%s7133_s0 + $0x330] sm:$0xff] }
  0x3b   :  { %v5200_v38 = vpack.c.bf16 %v4329_v36, %v4322_v35  ;;  %v4378_v35 = vld [vmem:[%s7133_s0 + $0x3a0] sm:$0xff]  ;;  %v4385_v36 = vld [vmem:[%s7133_s0 + $0x3d8] sm:$0xff] }
  0x3c   :  { %4283 = vmatmul.mubr.msk.f32.gmra.mrb[22].mxu1 %vm72_vm0, %v5900_v43  ;;  %v5238_v39 = vpack.c.bf16 %v4385_v36, %v4378_v35 }
  0x3d   :  { %4766 = vmatprep.mubr.msk.f32.mxu1 %vm72_vm0, %v5852_v26 }
  0x40   :  { %4767 = vmatmul.mubr.msk.f32.vlgmr.msra.gmra.mrb[24].mxu1 %vm72_vm0, %v5872_v33 }
  0x41   :  { %5159 = vmatpush1.bf16.msra.mxu1 %v5158_v42  ;;  %4769 = vmatprep.mubr.msk.f32.mxu1 %vm72_vm0, %v5892_v40  ;;  %v4354_v42 = vld [vmem:[%s7133_s0 + $0x2e0] sm:$0xff] }
  0x42   :  { %5161 = vmatprep.subr.bf16.mxu1 %v5160_v44  ;;  %v1707_v44 = vld [vmem:[%s7135_s2 + $0x8] sm:$0xff]  ;;  %v5204_v45 = vpack.c.bf16 %v4354_v42, %v4347_v41  ;;  %v4366_v42 = vld [vmem:[%s7133_s0 + $0x340] sm:$0xff] }
  0x43   :  { %1717 = vperm.xlu0 %5558, %v1707_v44   ;;  %v4373_v44 = vld [vmem:[%s7133_s0 + $0x378] sm:$0xff] }
  0x44   :  { %4770 = vmatmul.mubr.msk.f32.gmra.mrb[26].mxu1 %vm72_vm0, %v5900_v43 }
  0x45   :  { %5163 = vmatpush1.bf16.msra.mxu1 %v5162_v49  ;;  %544 = vmatprep.mubr.f32.mxu1 %v7141_v3  ;;  %v4361_v49 = vld [vmem:[%s7133_s0 + $0x318] sm:$0xff] }
  0x46   :  { %5165 = vmatprep.subr.bf16.mxu1 %v5164_v50  ;;  %v4368_v50 = vld [vmem:[%s7133_s0 + $0x350] sm:$0xff] }
  0x47   :  { %v5208_v53 = vpack.c.bf16 %v4368_v50, %v4361_v49  ;;  %v4405_v49 = vld [vmem:[%s7133_s0 + $0x3f8] sm:$0xff]  ;;  %v4412_v50 = vld [vmem:[%s7133_s0 + $0x430] sm:$0xff] }
  0x48   :  { %v5252_v51 = vpack.c.bf16 %v4412_v50, %v4405_v49 }
  0x49   :  { %5167 = vmatpush1.bf16.msra.mxu1 %v5166_v55  ;;  %v4367_v55 = vld [vmem:[%s7133_s0 + $0x348] sm:$0xff] }
  0x4a   :  { %5169 = vmatprep.subr.bf16.mxu1 %v5168_v56  ;;  %v4375_v56 = vld [vmem:[%s7133_s0 + $0x388] sm:$0xff]  ;;  %v5210_v58 = vpack.c.bf16 %v4367_v55, %v4360_v54  ;;  %v4426_v55 = vld [vmem:[%s7133_s0 + $0x4a0] sm:$0xff] }
  0x4b   :  { %v5212_v59 = vpack.c.bf16 %v4382_v57, %v4375_v56  ;;  %v4419_v54 = vld [vmem:[%s7133_s0 + $0x468] sm:$0xff] }
  0x4c   :  { %4330 = vmatmul.mubr.msk.f32.vlgmr.msra.gmra.mrb[28].mxu1 %vm72_vm0, %v5852_v26  ;;  %v5256_v57 = vpack.c.bf16 %v4426_v55, %v4419_v54 }
  0x4d   :  { %550 = vmatprep.mubr.f32.mxu1 %v7141_v3  ;;  %5171 = vmatpush1.bf16.msra.mxu1 %v5170_v61  ;;  %v4381_v61 = vld [vmem:[%s7133_s0 + $0x3b8] sm:$0xff] }
  0x4e   :  { %5173 = vmatprep.subr.bf16.mxu1 %v5172_v62  ;;  %v4349_v62 = vld [vmem:[%s7133_s0 + $0x2b8] sm:$0xff]  ;;  %v5214_v0 = vpack.c.bf16 %v4381_v61, %v4374_v60  ;;  %v4440_v61 = vld [vmem:[%s7133_s0 + $0x510] sm:$0xff] }
  0x4f   :  { %v5216_v1 = vpack.c.bf16 %v4356_v63, %v4349_v62  ;;  %v4433_v60 = vld [vmem:[%s7133_s0 + $0x4d8] sm:$0xff] }
  0x50   :  { %4331 = vmatmul.mubr.msk.f32.gmra.mrb[30].mxu1 %vm72_vm0, %v5872_v33  ;;  %v5260_v63 = vpack.c.bf16 %v4440_v61, %v4433_v60 }
  0x51   :  { %556 = vmatprep.mubr.f32.mxu1 %v7141_v3  ;;  %5175 = vmatpush1.bf16.msra.mxu1 %v5174_v4  ;;  %v4355_v4 = vld [vmem:[%s7133_s0 + $0x2e8] sm:$0xff] }
  0x52   :  { %5177 = vmatprep.subr.bf16.mxu1 %v5176_v5  ;;  %v4363_v5 = vld [vmem:[%s7133_s0 + $0x328] sm:$0xff]  ;;  %v5218_v7 = vpack.c.bf16 %v4355_v4, %v4348_v2  ;;  %v4409_v2 = vld [vmem:[%s7133_s0 + $0x418] sm:$0xff]  ;;  %v4416_v4 = vld [vmem:[%s7133_s0 + $0x450] sm:$0xff] }
  0x53   :  { %v5220_v8 = vpack.c.bf16 %v4370_v6, %v4363_v5  ;;  %v5276_v6 = vpack.c.bf16 %v4416_v4, %v4409_v2 }
  0x54   :  { %4332 = vmatmul.mubr.msk.f32.gmra.mrb[32].mxu1 %vm72_vm0, %v5892_v40 }
  0x55   :  { %562 = vmatprep.mubr.f32.mxu1 %v7141_v3  ;;  %5179 = vmatpush1.bf16.msra.mxu1 %v5178_v10  ;;  %v4369_v10 = vld [vmem:[%s7133_s0 + $0x358] sm:$0xff] }
  0x56   :  { %5181 = vmatprep.subr.bf16.mxu1 %v5180_v11  ;;  %v4377_v11 = vld [vmem:[%s7133_s0 + $0x398] sm:$0xff]  ;;  %v5222_v13 = vpack.c.bf16 %v4369_v10, %v4362_v9  ;;  %v4423_v9 = vld [vmem:[%s7133_s0 + $0x488] sm:$0xff]  ;;  %v4430_v10 = vld [vmem:[%s7133_s0 + $0x4c0] sm:$0xff] }
  0x57   :  { %v5224_v14 = vpack.c.bf16 %v4384_v12, %v4377_v11  ;;  %v5280_v12 = vpack.c.bf16 %v4430_v10, %v4423_v9 }
  0x58   :  { %4333 = vmatmul.mubr.msk.f32.gmra.mrb[34].mxu1 %vm72_vm0, %v5900_v43 }
  0x59   :  { %633 = vmatprep.mubr.f32.mxu1 %v7141_v3 }
  0x5c   :  { %4334 = vmatmul.mubr.msk.f32.vlgmr.msra.gmra.mrb[36].mxu1 %vm72_vm0, %v5852_v26 }
  0x5d   :  { %639 = vmatprep.mubr.f32.mxu1 %v7141_v3  ;;  %5183 = vmatpush1.bf16.msra.mxu1 %v5182_v16  ;;  %v4383_v16 = vld [vmem:[%s7133_s0 + $0x3c8] sm:$0xff] }
  0x5e   :  { %5185 = vmatprep.subr.bf16.mxu1 %v5184_v17  ;;  %v4351_v17 = vld [vmem:[%s7133_s0 + $0x2c8] sm:$0xff]  ;;  %v5226_v19 = vpack.c.bf16 %v4383_v16, %v4376_v15  ;;  %v4437_v15 = vld [vmem:[%s7133_s0 + $0x4f8] sm:$0xff]  ;;  %v4444_v16 = vld [vmem:[%s7133_s0 + $0x530] sm:$0xff] }
  0x5f   :  { %v5228_v20 = vpack.c.bf16 %v4358_v18, %v4351_v17  ;;  %v5284_v18 = vpack.c.bf16 %v4444_v16, %v4437_v15 }
  0x60   :  { %4335 = vmatmul.mubr.msk.f32.gmra.mrb[38].mxu1 %vm72_vm0, %v5872_v33 }
  0x61   :  { %645 = vmatprep.mubr.f32.mxu1 %v7141_v3  ;;  %5187 = vmatpush1.bf16.msra.mxu1 %v5186_v22  ;;  %v4357_v22 = vld [vmem:[%s7133_s0 + $0x2f8] sm:$0xff] }
  0x62   :  { %5189 = vmatprep.subr.bf16.mxu1 %v5188_v23  ;;  %v4365_v23 = vld [vmem:[%s7133_s0 + $0x338] sm:$0xff]  ;;  %v5230_v25 = vpack.c.bf16 %v4357_v22, %v4350_v21 }
  0x63   :  { %v5232_v27 = vpack.c.bf16 %v4372_v24, %v4365_v23 }
  0x64   :  { %4336 = vmatmul.mubr.msk.f32.gmra.mrb[40].mxu1 %vm72_vm0, %v5892_v40 }
  0x65   :  { %651 = vmatprep.mubr.f32.mxu1 %v7141_v3  ;;  %5191 = vmatpush1.bf16.msra.mxu1 %v5190_v29  ;;  %v4371_v29 = vld [vmem:[%s7133_s0 + $0x368] sm:$0xff] }
  0x66   :  { %5193 = vmatprep.subr.bf16.mxu1 %v5192_v30  ;;  %v5234_v32 = vpack.c.bf16 %v4371_v29, %v4364_v28 }
  0x68   :  { %4337 = vmatmul.mubr.msk.f32.gmra.mrb[42].mxu1 %vm72_vm0, %v5900_v43 }
  0x69   :  { %722 = vmatprep.mubr.f32.mxu1 %v7141_v3 }
  0x6c   :  { %4338 = vmatmul.mubr.msk.f32.vlgmr.msra.gmra.mrb[44].mxu1 %vm72_vm0, %v5852_v26 }
  0x6d   :  { %728 = vmatprep.mubr.f32.mxu1 %v7141_v3  ;;  %5195 = vmatpush3.bf16.msra.mxu1 %v5192_v30  ;;  %v4379_v30 = vld [vmem:[%s7133_s0 + $0x3a8] sm:$0xff] }
  0x6e   :  { %5197 = vmatprep.subr.bf16.mxu1 %v5196_v34 }
  0x70   :  { %4339 = vmatmul.mubr.msk.f32.gmra.mrb[46].mxu1 %vm72_vm0, %v5872_v33 }
  0x71   :  { %734 = vmatprep.mubr.f32.mxu1 %v7141_v3  ;;  %5199 = vmatpush3.bf16.msra.mxu1 %v5196_v34  ;;  %v5236_v34 = vpack.c.bf16 %v4386_v31, %v4379_v30 }
  0x72   :  { %5201 = vmatprep.subr.bf16.mxu1 %v5200_v38 }
  0x74   :  { %4340 = vmatmul.mubr.msk.f32.gmra.mrb[48].mxu1 %vm72_vm0, %v5892_v40 }
  0x75   :  { %740 = vmatprep.mubr.f32.mxu1 %v7141_v3  ;;  %5203 = vmatpush3.bf16.msra.mxu1 %v5200_v38  ;;  %v4359_v38 = vld [vmem:[%s7133_s0 + $0x308] sm:$0xff] }
  0x76   :  { %5205 = vmatprep.subr.bf16.mxu1 %v5204_v45  ;;  %v5240_v41 = vpack.c.bf16 %v4359_v38, %v4352_v37  ;;  %v5244_v45 = vpack.c.bf16 %v4373_v44, %v4366_v42 }
  0x78   :  { %4341 = vmatmul.mubr.msk.f32.gmra.mrb[50].mxu1 %vm72_vm0, %v5900_v43 }
  0x79   :  { %4784 = vmatprep.mubr.msk.f32.mxu1 %vm72_vm0, %v5852_v26 }
  0x7c   :  { %4785 = vmatmul.mubr.msk.f32.vlgmr.msra.gmra.mrb[52].mxu1 %vm72_vm0, %v5872_v33 }
  0x7d   :  { %5207 = vmatpush1.bf16.msra.mxu1 %v5206_v52  ;;  %4787 = vmatprep.mubr.msk.f32.mxu1 %vm72_vm0, %v5892_v40  ;;  %v4404_v52 = vld [vmem:[%s7133_s0 + $0x3f0] sm:$0xff] }
  0x7e   :  { %5209 = vmatprep.subr.bf16.mxu1 %v5208_v53  ;;  %v4411_v53 = vld [vmem:[%s7133_s0 + $0x428] sm:$0xff] }
  0x7f   :  { %v5254_v56 = vpack.c.bf16 %v4411_v53, %v4404_v52 }
  0x80   :  { %4788 = vmatmul.mubr.msk.f32.gmra.mrb[54].mxu1 %vm72_vm0, %v5900_v43 }
  0x81   :  { %5211 = vmatpush1.bf16.msra.mxu1 %v5210_v58  ;;  %967 = vmatprep.mubr.f32.mxu1 %v7141_v3  ;;  %v4418_v58 = vld [vmem:[%s7133_s0 + $0x460] sm:$0xff] }
  0x82   :  { %5213 = vmatprep.subr.bf16.mxu1 %v5212_v59  ;;  %v4425_v59 = vld [vmem:[%s7133_s0 + $0x498] sm:$0xff] }
  0x83   :  { %v5258_v62 = vpack.c.bf16 %v4425_v59, %v4418_v58 }
  0x85   :  { %5215 = vmatpush1.bf16.msra.mxu1 %v5214_v0  ;;  %v4432_v0 = vld [vmem:[%s7133_s0 + $0x4d0] sm:$0xff] }
  0x86   :  { %5217 = vmatprep.subr.bf16.mxu1 %v5216_v1  ;;  %v4439_v1 = vld [vmem:[%s7133_s0 + $0x508] sm:$0xff] }
  0x87   :  { %v5262_v5 = vpack.c.bf16 %v4439_v1, %v4432_v0 }
  0x88   :  { %4388 = vmatmul.mubr.msk.f32.vlgmr.msra.gmra.mrb[56].mxu1 %vm72_vm0, %v5852_v26 }
  0x89   :  { %973 = vmatprep.mubr.f32.mxu1 %v7141_v3  ;;  %5219 = vmatpush1.bf16.msra.mxu1 %v5218_v7  ;;  %v4408_v7 = vld [vmem:[%s7133_s0 + $0x410] sm:$0xff] }
  0x8a   :  { %5221 = vmatprep.subr.bf16.mxu1 %v5220_v8  ;;  %v4415_v8 = vld [vmem:[%s7133_s0 + $0x448] sm:$0xff] }
  0x8b   :  { %v5278_v11 = vpack.c.bf16 %v4415_v8, %v4408_v7 }
  0x8c   :  { %4389 = vmatmul.mubr.msk.f32.gmra.mrb[58].mxu1 %vm72_vm0, %v5872_v33 }
  0x8d   :  { %979 = vmatprep.mubr.f32.mxu1 %v7141_v3  ;;  %5223 = vmatpush1.bf16.msra.mxu1 %v5222_v13  ;;  %v4422_v13 = vld [vmem:[%s7133_s0 + $0x480] sm:$0xff] }
  0x8e   :  { %5225 = vmatprep.subr.bf16.mxu1 %v5224_v14  ;;  %v4429_v14 = vld [vmem:[%s7133_s0 + $0x4b8] sm:$0xff] }
  0x8f   :  { %v5282_v17 = vpack.c.bf16 %v4429_v14, %v4422_v13 }
  0x90   :  { %4390 = vmatmul.mubr.msk.f32.gmra.mrb[60].mxu1 %vm72_vm0, %v5892_v40 }
  0x91   :  { %985 = vmatprep.mubr.f32.mxu1 %v7141_v3  ;;  %5227 = vmatpush1.bf16.msra.mxu1 %v5226_v19  ;;  %v4436_v19 = vld [vmem:[%s7133_s0 + $0x4f0] sm:$0xff] }
  0x92   :  { %5229 = vmatprep.subr.bf16.mxu1 %v5228_v20  ;;  %v4443_v20 = vld [vmem:[%s7133_s0 + $0x528] sm:$0xff]  ;;  %s5748_s0 = smov 96  }
  0x93   :  { %v5286_v21 = vpack.c.bf16 %v4443_v20, %v4436_v19 }
  0x94   :  { %4391 = vmatmul.mubr.msk.f32.gmra.mrb[62].mxu1 %vm72_vm0, %v5900_v43 }
  0x95   :  { %1056 = vmatprep.mubr.f32.mxu1 %v7141_v3 }
  0x98   :  { %4392 = vmatmul.mubr.msk.f32.vlgmr.msra.gmra.mrb[64].mxu1 %vm72_vm0, %v5852_v26 }
  0x99   :  { %1062 = vmatprep.mubr.f32.mxu1 %v7141_v3  ;;  %5231 = vmatpush1.bf16.msra.mxu1 %v5230_v25 }
  0x9a   :  { %5233 = vmatprep.subr.bf16.mxu1 %v5232_v27 }
  0x9c   :  { %4393 = vmatmul.mubr.msk.f32.gmra.mrb[66].mxu1 %vm72_vm0, %v5872_v33 }
  0x9d   :  { %1068 = vmatprep.mubr.f32.mxu1 %v7141_v3  ;;  %5235 = vmatpush1.bf16.msra.mxu1 %v5234_v32 }
  0x9e   :  { %5237 = vmatprep.subr.bf16.mxu1 %v5236_v34 }
  0xa0   :  { %4394 = vmatmul.mubr.msk.f32.gmra.mrb[68].mxu1 %vm72_vm0, %v5892_v40 }
  0xa1   :  { %1074 = vmatprep.mubr.f32.mxu1 %v7141_v3  ;;  %5239 = vmatpush1.bf16.msra.mxu1 %v5238_v39 }
  0xa2   :  { %5241 = vmatprep.subr.bf16.mxu1 %v5240_v41 }
  0xa4   :  { %4395 = vmatmul.mubr.msk.f32.gmra.mrb[70].mxu1 %vm72_vm0, %v5900_v43 }
  0xa5   :  { %1145 = vmatprep.mubr.f32.mxu1 %v7141_v3 }
  0xa8   :  { %4396 = vmatmul.mubr.msk.f32.vlgmr.msra.gmra.mrb[72].mxu1 %vm72_vm0, %v5852_v26 }
  0xa9   :  { %1151 = vmatprep.mubr.f32.mxu1 %v7141_v3  ;;  %5243 = vmatpush3.bf16.msra.mxu1 %v5240_v41 }
  0xaa   :  { %5245 = vmatprep.subr.bf16.mxu1 %v5244_v45 }
  0xac   :  { %4397 = vmatmul.mubr.msk.f32.gmra.mrb[74].mxu1 %vm72_vm0, %v5872_v33 }
  0xad   :  { %1157 = vmatprep.mubr.f32.mxu1 %v7141_v3  ;;  %5247 = vmatpush3.bf16.msra.mxu1 %v5244_v45 }
  0xae   :  { %5249 = vmatprep.subr.bf16.mxu1 %v5248_v48 }
  0xb0   :  { %4398 = vmatmul.mubr.msk.f32.gmra.mrb[76].mxu1 %vm72_vm0, %v5892_v40 }
  0xb1   :  { %1163 = vmatprep.mubr.f32.mxu1 %v7141_v3  ;;  %5251 = vmatpush3.bf16.msra.mxu1 %v5248_v48 }
  0xb2   :  { %5253 = vmatprep.subr.bf16.mxu1 %v5252_v51 }
  0xb4   :  { %4399 = vmatmul.mubr.msk.f32.gmra.mrb[78].mxu1 %vm72_vm0, %v5900_v43 }
  0xb5   :  { %4802 = vmatprep.mubr.msk.f32.mxu1 %vm72_vm0, %v5852_v26 }
  0xb8   :  { %4803 = vmatmul.mubr.msk.f32.vlgmr.msra.gmra.mrb[80].mxu1 %vm72_vm0, %v5872_v33 }
  0xb9   :  { %5255 = vmatpush1.bf16.msra.mxu1 %v5254_v56  ;;  %4805 = vmatprep.mubr.msk.f32.mxu1 %vm72_vm0, %v5892_v40 }
  0xba   :  { %5257 = vmatprep.subr.bf16.mxu1 %v5256_v57 }
  0xbc   :  { %4806 = vmatmul.mubr.msk.f32.gmra.mrb[82].mxu1 %vm72_vm0, %v5900_v43 }
  0xbd   :  { %5259 = vmatpush1.bf16.msra.mxu1 %v5258_v62  ;;  %1390 = vmatprep.mubr.f32.mxu1 %v7141_v3 }
  0xbe   :  { %5261 = vmatprep.subr.bf16.mxu1 %v5260_v63 }
  0xc1   :  { %5263 = vmatpush1.bf16.msra.mxu1 %v5262_v5 }
  0xc2   :  { %5277 = vmatprep.subr.bf16.mxu1 %v5276_v6 }
  0xc4   :  { %4446 = vmatmul.mubr.msk.f32.vlgmr.msra.gmra.mrb[84].mxu1 %vm72_vm0, %v5852_v26 }
  0xc5   :  { %1396 = vmatprep.mubr.f32.mxu1 %v7141_v3  ;;  %5279 = vmatpush1.bf16.msra.mxu1 %v5278_v11 }
  0xc6   :  { %5281 = vmatprep.subr.bf16.mxu1 %v5280_v12 }
  0xc8   :  { %4447 = vmatmul.mubr.msk.f32.gmra.mrb[86].mxu1 %vm72_vm0, %v5872_v33 }
  0xc9   :  { %1402 = vmatprep.mubr.f32.mxu1 %v7141_v3  ;;  %5283 = vmatpush1.bf16.msra.mxu1 %v5282_v17 }
  0xca   :  { %5285 = vmatprep.subr.bf16.mxu1 %v5284_v18 }
  0xcc   :  { %4448 = vmatmul.mubr.msk.f32.gmra.mrb[88].mxu1 %vm72_vm0, %v5892_v40 }
  0xcd   :  { %1408 = vmatprep.mubr.f32.mxu1 %v7141_v3  ;;  %5287 = vmatpush1.bf16.msra.mxu1 %v5286_v21 }
  0xd0   :  { %4449 = vmatmul.mubr.msk.f32.gmra.mrb[90].mxu1 %vm72_vm0, %v5900_v43 }
  0xd1   :  { %1568 = vmatprep.mubr.f32.mxu1 %v7141_v3 }
  0xd4   :  { %4454 = vmatmul.mubr.msk.f32.vlgmr.msra.gmra.mrb[92].mxu1 %vm72_vm0, %v5852_v26 }
  0xd5   :  { %1574 = vmatprep.mubr.f32.mxu1 %v7141_v3 }
  0xd8   :  { %4455 = vmatmul.mubr.msk.f32.gmra.mrb[94].mxu1 %vm72_vm0, %v5872_v33 }
  0xd9   :  { %1580 = vmatprep.mubr.f32.mxu1 %v7141_v3 }
  0xdc   :  { %4456 = vmatmul.mubr.msk.f32.gmra.mrb[96].mxu1 %vm72_vm0, %v5892_v40 }
  0xdd   :  { %1586 = vmatprep.mubr.f32.mxu1 %v7141_v3 }
  0xe0   :  { %4457 = vmatmul.mubr.msk.f32.gmra.mrb[98].mxu1 %vm72_vm0, %v5900_v43 }
  0xe3   :  { %v6505_v22 = vpop.f32.mrb[0].mxu1 }
  0xe4   :  { %v6507_v23 = vpop.f32.mrb[1].mxu1 }
  0xe7   :  { %v6509_v26 = vpop.f32.mrb[2].mxu1 }
  0xe8   :  { %v6511_v24 = vpop.f32.mrb[3].mxu1 }
  0xeb   :  { %v6513_v25 = vpop.f32.mrb[4].mxu1 }
  0xec   :  { %v6515_v33 = vpop.f32.mrb[5].mxu1 }
  0xef   :  { %v6517_v27 = vpop.f32.mrb[6].mxu1 }
  0xf0   :  { %v6519_v40 = vpop.f32.mrb[7].mxu1 }
  0xf1   :  { %v6541_v38 = vpop.f32.mrb[0].mxu0 }
  0xf2   :  { %v6545_v41 = vpop.f32.mrb[1].mxu0 }
  0xf3   :  { %v6521_v28 = vpop.f32.mrb[8].mxu1 }
  0xf4   :  { %v6523_v29 = vpop.f32.mrb[9].mxu1 }
  0xf5   :  { %v6549_v44 = vpop.f32.mrb[2].mxu0 }
  0xf6   :  { %v6553_v46 = vpop.f32.mrb[3].mxu0 }
  0xf7   :  { %v6525_v43 = vpop.f32.mrb[10].mxu1 }
  0xf8   :  { %v6527_v30 = vpop.f32.mrb[11].mxu1 }
  0xf9   :  { %v6557_v48 = vpop.f32.mrb[4].mxu0 }
  0xfa   :  { %v6561_v50 = vpop.f32.mrb[5].mxu0 }
  0xfb   :  { %v6529_v31 = vpop.f32.mrb[12].mxu1 }
  0xfc   :  { %v6531_v32 = vpop.f32.mrb[13].mxu1 }
  0xfd   :  { %v6565_v52 = vpop.f32.mrb[6].mxu0 }
  0xfe   :  { %v6569_v54 = vpop.f32.mrb[7].mxu0 }
  0xff   :  { %v6533_v34 = vpop.f32.mrb[14].mxu1 }
 0x100   :  { %v6535_v35 = vpop.f32.mrb[15].mxu1 }
 0x101   :  { %v6573_v56 = vpop.f32.mrb[8].mxu0 }
 0x102   :  { %7144 = vst [vmem:[#allocation2_spill] sm:$0xff] %v6573_v56  ;;  %v6577_v58 = vpop.f32.mrb[9].mxu0 }
 0x103   :  { %v6537_v36 = vpop.f32.mrb[16].mxu1  ;;  %7146 = vst [vmem:[#allocation4_spill] sm:$0xff] %v6577_v58 }
 0x104   :  { %v6539_v37 = vpop.f32.mrb[17].mxu1 }
 0x105   :  { %v6581_v60 = vpop.f32.mrb[10].mxu0 }
 0x106   :  { %7147 = vst [vmem:[#allocation5_spill] sm:$0xff] %v6581_v60  ;;  %v6583_v61 = vpop.f32.mrb[11].mxu0 }
 0x107   :  { %v6543_v39 = vpop.f32.mrb[18].mxu1  ;;  %7148 = vst [vmem:[#allocation6_spill] sm:$0xff] %v6583_v61 }
 0x108   :  { %v6547_v42 = vpop.f32.mrb[19].mxu1 }
 0x10b   :  { %v6551_v45 = vpop.f32.mrb[20].mxu1 }
 0x10c   :  { %v6555_v47 = vpop.f32.mrb[21].mxu1 }
 0x10f   :  { %v6559_v49 = vpop.f32.mrb[22].mxu1 }
 0x110   :  { %v6563_v51 = vpop.f32.mrb[23].mxu1 }
 0x113   :  { %v6567_v53 = vpop.f32.mrb[24].mxu1 }
 0x114   :  { %v6571_v55 = vpop.f32.mrb[25].mxu1 }
 0x117   :  { %v6575_v57 = vpop.f32.mrb[26].mxu1 }
 0x118   :  { %7145 = vst [vmem:[#allocation3_spill] sm:$0xff] %v6575_v57  ;;  %v6579_v59 = vpop.f32.mrb[27].mxu1 }
 0x11f   :  { %v546_v62 = vpop.f32.mrb[28].mxu1 }
 0x120   :  { %v832_v63 = vmax.f32 %v6505_v22, %v546_v62  ;;  %v548_v0 = vpop.f32.mrb[29].mxu1 }
 0x121   :  { %v833_v1 = vmax.f32 %v6507_v23, %v548_v0 }
 0x123   :  { %v552_v2 = vpop.f32.mrb[30].mxu1 }
 0x124   :  { %v839_v4 = vmax.f32 %v6509_v26, %v552_v2  ;;  %v554_v5 = vpop.f32.mrb[31].mxu1 }
 0x125   :  { %v840_v6 = vmax.f32 %v6511_v24, %v554_v5 }
 0x127   :  { %v558_v7 = vpop.f32.mrb[32].mxu1 }
 0x128   :  { %v846_v8 = vmax.f32 %v6513_v25, %v558_v7  ;;  %v560_v9 = vpop.f32.mrb[33].mxu1 }
 0x129   :  { %v847_v10 = vmax.f32 %v6515_v33, %v560_v9 }
 0x12b   :  { %v564_v11 = vpop.f32.mrb[34].mxu1 }
 0x12c   :  { %v853_v12 = vmax.f32 %v6517_v27, %v564_v11  ;;  %v566_v13 = vpop.f32.mrb[35].mxu1 }
 0x12d   :  { %v854_v14 = vmax.f32 %v6519_v40, %v566_v13 }
 0x12f   :  { %v635_v15 = vpop.f32.mrb[36].mxu1 }
 0x130   :  { %v834_v16 = vmax.f32 %v6521_v28, %v635_v15  ;;  %v637_v17 = vpop.f32.mrb[37].mxu1 }
 0x131   :  { %v835_v18 = vmax.f32 %v6523_v29, %v637_v17 }
 0x133   :  { %v641_v19 = vpop.f32.mrb[38].mxu1 }
 0x134   :  { %v841_v20 = vmax.f32 %v6525_v43, %v641_v19  ;;  %v643_v21 = vpop.f32.mrb[39].mxu1 }
 0x135   :  { %v842_v22 = vmax.f32 %v6527_v30, %v643_v21 }
 0x137   :  { %v6597_v23 = vpop.f32.mrb[40].mxu1 }
 0x138   :  { %v6601_v24 = vpop.f32.mrb[41].mxu1 }
 0x13b   :  { %v6605_v33 = vpop.f32.mrb[42].mxu1 }
 0x13c   :  { %v6609_v40 = vpop.f32.mrb[43].mxu1 }
 0x13f   :  { %v6613_v29 = vpop.f32.mrb[44].mxu1 }
 0x140   :  { %v6617_v30 = vpop.f32.mrb[45].mxu1 }
 0x143   :  { %v6621_v0 = vpop.f32.mrb[46].mxu1 }
 0x144   :  { %v6625_v5 = vpop.f32.mrb[47].mxu1 }
 0x147   :  { %v6629_v9 = vpop.f32.mrb[48].mxu1 }
 0x148   :  { %v6633_v13 = vpop.f32.mrb[49].mxu1 }
 0x14b   :  { %v6637_v17 = vpop.f32.mrb[50].mxu1 }
 0x14c   :  { %v6641_v21 = vpop.f32.mrb[51].mxu1 }
 0x14f   :  { %v6645_v7 = vpop.f32.mrb[52].mxu1 }
 0x150   :  { %v6649_v2 = vpop.f32.mrb[53].mxu1 }
 0x153   :  { %v6653_v62 = vpop.f32.mrb[54].mxu1 }
 0x154   :  { %7149 = vst [vmem:[#allocation7_spill] sm:$0xff] %v6653_v62  ;;  %v6657_v43 = vpop.f32.mrb[55].mxu1 }
 0x15b   :  { %v969_v28 = vpop.f32.mrb[56].mxu1 }
 0x15c   :  { %v6661_v27 = vmax.f32 %v832_v63, %v969_v28  ;;  %v971_v25 = vpop.f32.mrb[57].mxu1 }
 0x15d   :  { %v6663_v11 = vmax.f32 %v833_v1, %v971_v25  ;;  %v6677_v25 = vpop.permute.xlu0 %1712 }
 0x15f   :  { %v975_v26 = vpop.f32.mrb[58].mxu1 }
 0x160   :  { %v6665_v61 = vmax.f32 %v839_v4, %v975_v26  ;;  %v977_v15 = vpop.f32.mrb[59].mxu1 }
 0x161   :  { %v6667_v60 = vmax.f32 %v840_v6, %v977_v15 }
 0x162   :  { %7150 = vst [vmem:[#allocation8_spill] sm:$0xff] %v6665_v61 }
 0x163   :  { %v981_v58 = vpop.f32.mrb[60].mxu1 }
 0x164   :  { %v6669_v56 = vmax.f32 %v846_v8, %v981_v58  ;;  %v983_v19 = vpop.f32.mrb[61].mxu1 }
 0x165   :  { %v6671_v62 = vmax.f32 %v847_v10, %v983_v19 }
 0x167   :  { %7151 = vst [vmem:[#allocation9_spill] sm:$0xff] %v6671_v62  ;;  %v987_v57 = vpop.f32.mrb[62].mxu1  ;;  %v6681_v62 = vpop.permute.xlu0 %1717 }
 0x168   :  { %v6673_v3 = vmax.f32 %v853_v12, %v987_v57  ;;  %v989_v63 = vpop.f32.mrb[63].mxu1 }
 0x169   :  { %v6675_v28 = vmax.f32 %v854_v14, %v989_v63  ;;  %v6685_v63 = vpop.permute.xlu1 %1722 }
 0x16b   :  { %v1058_v1 = vpop.f32.mrb[64].mxu1 }
 0x16c   :  { %v1257_v4 = vmax.f32 %v834_v16, %v1058_v1  ;;  %v1060_v26 = vpop.f32.mrb[65].mxu1  ;;  %v7152_v16 = vmax.f32 %v6529_v31, %v6597_v23 }
 0x16d   :  { %v1258_v61 = vmax.f32 %v835_v18, %v1060_v26 }
 0x16e   :  { %v1680_v6 = vmax.f32 %v1257_v4, %v6541_v38 }
 0x16f   :  { %v1681_v58 = vmax.f32 %v1258_v61, %v6545_v41  ;;  %v1064_v8 = vpop.f32.mrb[66].mxu1 }
 0x170   :  { %v1264_v15 = vmax.f32 %v841_v20, %v1064_v8  ;;  %v1066_v10 = vpop.f32.mrb[67].mxu1  ;;  %v1732_v41 = vadd.f32 %v6677_v25, %v1680_v6  ;;  %v7153_v20 = vmax.f32 %v6531_v32, %v6601_v24  ;;  %v7154_v6 = vmax.f32 %v6533_v34, %v6605_v33 }
 0x171   :  { %v1265_v19 = vmax.f32 %v842_v22, %v1066_v10  ;;  %v6713_v10 = vpop.permute.xlu1 %1727  ;;  %v7156_v34 = vmax.f32 %v6537_v36, %v6613_v29 }
 0x172   :  { %v1687_v57 = vmax.f32 %v1264_v15, %v6549_v44  ;;  %v1733_v44 = vadd.f32 %v6677_v25, %v1681_v58  ;;  %v7155_v58 = vmax.f32 %v6535_v35, %v6609_v40  ;;  %v7157_v35 = vmax.f32 %v6539_v37, %v6617_v30 }
 0x173   :  { %v1688_v12 = vmax.f32 %v1265_v19, %v6553_v46  ;;  %v1070_v14 = vpop.f32.mrb[68].mxu1  ;;  %v7159_v30 = vmax.f32 %v6547_v42, %v6625_v5  ;;  %v7163_v5 = vmax.f32 %v6563_v51, %v6641_v21  ;;  %v7168_v51 = vld [vmem:[#allocation3_spill] sm:$0xff] }
 0x174   :  { %v1271_v18 = vmax.f32 %v7152_v16, %v1070_v14  ;;  %v1072_v38 = vpop.f32.mrb[69].mxu1  ;;  %v1739_v61 = vadd.f32 %v6681_v62, %v1687_v57  ;;  %v7169_v21 = vld [vmem:[#allocation7_spill] sm:$0xff] }
 0x175   :  { %v1272_v22 = vmax.f32 %v7153_v20, %v1072_v38  ;;  %v1740_v46 = vadd.f32 %v6681_v62, %v1688_v12 }
 0x176   :  { %v1694_v1 = vmax.f32 %v1271_v18, %v6557_v48  ;;  %v6698_v4 = vpack.i.bf16 %v1739_v61, %v1732_v41  ;;  %v6706_v32 = vpack.c.bf16 %v1739_v61, %v1732_v41  ;;  %v7158_v61 = vmax.f32 %v6543_v39, %v6621_v0 }
 0x177   :  { %v1695_v31 = vmax.f32 %v1272_v22, %v6561_v50  ;;  %v1076_v23 = vpop.f32.mrb[70].mxu1  ;;  %v6701_v26 = vpack.i.bf16 %v1740_v46, %v1733_v44  ;;  %v6708_v24 = vpack.c.bf16 %v1740_v46, %v1733_v44  ;;  %v7160_v46 = vmax.f32 %v6551_v45, %v6629_v9 }
 0x178   :  { %v1278_v8 = vmax.f32 %v7154_v6, %v1076_v23  ;;  %v1078_v15 = vpop.f32.mrb[71].mxu1  ;;  %v1746_v14 = vadd.f32 %v6685_v63, %v1694_v1  ;;  %v7161_v23 = vmax.f32 %v6555_v47, %v6633_v13  ;;  %v7162_v0 = vmax.f32 %v6559_v49, %v6637_v17  ;;  %v7167_v17 = vld [vmem:[#allocation4_spill] sm:$0xff] }
 0x179   :  { %v1279_v48 = vmax.f32 %v7155_v58, %v1078_v15  ;;  %v7164_v9 = vmax.f32 %v6567_v53, %v6645_v7  ;;  %v7165_v13 = vmax.f32 %v6571_v55, %v6649_v2  ;;  %v7171_v7 = vmax.f32 %v6579_v59, %v6657_v43  ;;  %v7172_v55 = vld [vmem:[#allocation5_spill] sm:$0xff]  ;;  %v7174_v43 = vld [vmem:[#allocation8_spill] sm:$0xff] }
 0x17a   :  { %v1701_v50 = vmax.f32 %v1278_v8, %v6565_v52  ;;  %v1747_v52 = vadd.f32 %v6685_v63, %v1695_v31 }
 0x17b   :  { %v1702_v19 = vmax.f32 %v1279_v48, %v6569_v54  ;;  %v1147_v57 = vpop.f32.mrb[72].mxu1 }
 0x17c   :  { %v6720_v33 = vmax.f32 %v7156_v34, %v1147_v57  ;;  %v1149_v12 = vpop.f32.mrb[73].mxu1  ;;  %v1753_v16 = vadd.f32 %v6713_v10, %v1701_v50  ;;  %v7166_v50 = vld [vmem:[#allocation2_spill] sm:$0xff] }
 0x17d   :  { %v6727_v40 = vmax.f32 %v7157_v35, %v1149_v12  ;;  %v1754_v54 = vadd.f32 %v6713_v10, %v1702_v19  ;;  %v7170_v12 = vmax.f32 %v7168_v51, %v7169_v21 }
 0x17e   :  { %v6731_v18 = vpack.i.bf16 %v1753_v16, %v1746_v14  ;;  %v6733_v38 = vpack.c.bf16 %v1753_v16, %v1746_v14 }
 0x17f   :  { %v1153_v36 = vpop.f32.mrb[74].mxu1  ;;  %v6735_v29 = vpack.i.bf16 %v1754_v54, %v1747_v52  ;;  %v6737_v41 = vpack.c.bf16 %v1754_v54, %v1747_v52  ;;  %v7173_v52 = vld [vmem:[#allocation6_spill] sm:$0xff] }
 0x180   :  { %v6742_v20 = vmax.f32 %v7158_v61, %v1153_v36  ;;  %v1155_v37 = vpop.f32.mrb[75].mxu1 }
 0x181   :  { %v6747_v22 = vmax.f32 %v7159_v30, %v1155_v37 }
 0x183   :  { %v1159_v44 = vpop.f32.mrb[76].mxu1 }
 0x184   :  { %v6752_v1 = vmax.f32 %v7160_v46, %v1159_v44  ;;  %v1161_v31 = vpop.f32.mrb[77].mxu1 }
 0x185   :  { %v6757_v6 = vmax.f32 %v7161_v23, %v1161_v31 }
 0x187   :  { %v1165_v39 = vpop.f32.mrb[78].mxu1 }
 0x188   :  { %v6762_v8 = vmax.f32 %v7162_v0, %v1165_v39  ;;  %v1167_v42 = vpop.f32.mrb[79].mxu1 }
 0x189   :  { %v6767_v15 = vmax.f32 %v7163_v5, %v1167_v42 }
 0x18b   :  { %v4804_v45 = vpop.f32.mrb[80].mxu1 }
 0x18c   :  { %v1268_v58 = vmax.f32 %v7164_v9, %v4804_v45  ;;  %v1236_v47 = vpop.f32.mrb[81].mxu1 }
 0x18d   :  { %v1261_v48 = vmax.f32 %v7165_v13, %v1236_v47 }
 0x18e   :  { %v1691_v49 = vmax.f32 %v1268_v58, %v7166_v50 }
 0x18f   :  { %v1684_v19 = vmax.f32 %v1261_v48, %v7167_v17  ;;  %v4807_v57 = vpop.f32.mrb[82].mxu1 }
 0x190   :  { %v1743_v34 = vadd.f32 %v6681_v62, %v1691_v49  ;;  %v1282_v14 = vmax.f32 %v7170_v12, %v4807_v57  ;;  %v1246_v16 = vpop.f32.mrb[83].mxu1 }
 0x191   :  { %v1736_v53 = vadd.f32 %v6677_v25, %v1684_v19  ;;  %v1275_v35 = vmax.f32 %v7171_v7, %v1246_v16 }
 0x192   :  { %v1705_v2 = vmax.f32 %v1282_v14, %v7172_v55 }
 0x193   :  { %v1698_v54 = vmax.f32 %v1275_v35, %v7173_v52  ;;  %v6787_v36 = vpack.c.bf16 %v1743_v34, %v1736_v53 }
 0x194   :  { %v1757_v61 = vadd.f32 %v6713_v10, %v1705_v2 }
 0x195   :  { %v1750_v37 = vadd.f32 %v6685_v63, %v1698_v54 }
 0x197   :  { %v1392_v30 = vpop.f32.mrb[84].mxu1  ;;  %v6791_v44 = vpack.c.bf16 %v1757_v61, %v1750_v37 }
 0x198   :  { %v1678_v46 = vmax.f32 %v6661_v27, %v1392_v30  ;;  %v1394_v31 = vpop.f32.mrb[85].mxu1 }
 0x199   :  { %v1679_v23 = vmax.f32 %v6663_v11, %v1394_v31  ;;  %v7175_v11 = vld [vmem:[#allocation9_spill] sm:$0xff] }
 0x19a   :  { %v1730_v5 = vadd.f32 %v6677_v25, %v1678_v46 }
 0x19b   :  { %v1398_v59 = vpop.f32.mrb[86].mxu1  ;;  %v1731_v9 = vadd.f32 %v6677_v25, %v1679_v23 }
 0x19c   :  { %v1685_v39 = vmax.f32 %v7174_v43, %v1398_v59  ;;  %v1400_v0 = vpop.f32.mrb[87].mxu1 }
 0x19d   :  { %v1686_v42 = vmax.f32 %v6667_v60, %v1400_v0 }
 0x19e   :  { %v1737_v45 = vadd.f32 %v6681_v62, %v1685_v39 }
 0x19f   :  { %v1738_v58 = vadd.f32 %v6681_v62, %v1686_v42  ;;  %v1404_v47 = vpop.f32.mrb[88].mxu1 }
 0x1a0   :  { %v1692_v27 = vmax.f32 %v6669_v56, %v1404_v47  ;;  %v1406_v13 = vpop.f32.mrb[89].mxu1  ;;  %v5560_v48 = vpack.i.bf16 %v1737_v45, %v1730_v5  ;;  %v6804_v60 = vpack.c.bf16 %v1737_v45, %v1730_v5  ;;  %v4462_v56 = vld [vmem:[%s7136_s3 + $0x10] sm:$0xff] }
 0x1a1   :  { %v1693_v50 = vmax.f32 %v7175_v11, %v1406_v13  ;;  %v5590_v49 = vpack.i.bf16 %v1738_v58, %v1731_v9  ;;  %v6806_v17 = vpack.c.bf16 %v1738_v58, %v1731_v9  ;;  %4834 = vmatprep.mubr.msk.f32.mxu0 %vm1779_vm1, %v4462_v56 }
 0x1a2   :  { %5561 = vrot.lane.b32.xlu0 %v5560_v48, %s5748_s0  ;;  %v1744_v21 = vadd.f32 %v6685_v63, %v1692_v27 }
 0x1a3   :  { %v1410_v19 = vpop.f32.mrb[90].mxu1  ;;  %v1745_v14 = vadd.f32 %v6685_v63, %v1693_v50 }
 0x1a4   :  { %v1699_v57 = vmax.f32 %v6673_v3, %v1410_v19  ;;  %v1412_v34 = vpop.f32.mrb[91].mxu1 }
 0x1a5   :  { %v1700_v51 = vmax.f32 %v6675_v28, %v1412_v34  ;;  %v1758_v34 = vld [vmem:[%s7136_s3] sm:$0xff] }
 0x1a6   :  { %v1751_v12 = vadd.f32 %v6713_v10, %v1699_v57  ;;  %5571 = vrot.lane.b32.xlu0 %v5560_v48, %s5749_s16  ;;  %v4463_v57 = vld [vmem:[%s7136_s3 + $0x18] sm:$0xff] }
 0x1a7   :  { %v1752_v3 = vadd.f32 %v6713_v10, %v1700_v51  ;;  %v1570_v16 = vpop.f32.mrb[92].mxu1 }
 0x1a8   :  { %v1682_v53 = vmax.f32 %v6720_v33, %v1570_v16  ;;  %v1572_v7 = vpop.f32.mrb[93].mxu1  ;;  %v5565_v35 = vpack.i.bf16 %v1751_v12, %v1744_v21  ;;  %v6823_v2 = vpack.c.bf16 %v1751_v12, %v1744_v21 }
 0x1a9   :  { %v1683_v28 = vmax.f32 %v6727_v40, %v1572_v7  ;;  %v5595_v55 = vpack.i.bf16 %v1752_v3, %v1745_v14  ;;  %v6825_v52 = vpack.c.bf16 %v1752_v3, %v1745_v14  ;;  %v4468_v7 = vld [vmem:[%s7136_s3 + $0x20] sm:$0xff] }
 0x1aa   :  { %5581 = vrot.lane.b32.xlu0 %v5560_v48, %s5750_s17  ;;  %5566 = vrot.lane.b32.xlu1 %v5565_v35, %s5748_s0  ;;  %v1734_v30 = vadd.f32 %v6677_v25, %v1682_v53  ;;  %v1759_v53 = vld [vmem:[%s7136_s3 + $0x8] sm:$0xff] }
 0x1ab   :  { %v1576_v54 = vpop.f32.mrb[94].mxu1  ;;  %v1735_v46 = vadd.f32 %v6677_v25, %v1683_v28 }
 0x1ac   :  { %v1689_v61 = vmax.f32 %v6742_v20, %v1576_v54  ;;  %v1578_v37 = vpop.f32.mrb[95].mxu1 }
 0x1ad   :  { %v1690_v33 = vmax.f32 %v6747_v22, %v1578_v37  ;;  %v4469_v37 = vld [vmem:[%s7136_s3 + $0x28] sm:$0xff] }
 0x1ae   :  { %v1741_v40 = vadd.f32 %v6681_v62, %v1689_v61  ;;  %5591 = vrot.lane.b32.xlu0 %v5590_v49, %s5748_s0  ;;  %5576 = vrot.lane.b32.xlu1 %v5565_v35, %s5749_s16 }
 0x1af   :  { %v1742_v31 = vadd.f32 %v6681_v62, %v1690_v33  ;;  %v1582_v23 = vpop.f32.mrb[96].mxu1  ;;  %v4472_v33 = vld [vmem:[%s7136_s3 + $0x30] sm:$0xff] }
 0x1b0   :  { %v1696_v59 = vmax.f32 %v6752_v1, %v1582_v23  ;;  %v1584_v43 = vpop.f32.mrb[97].mxu1  ;;  %v5680_v20 = vpack.i.bf16 %v1741_v40, %v1734_v30  ;;  %v6839_v0 = vpack.c.bf16 %v1741_v40, %v1734_v30 }
 0x1b1   :  { %v1697_v39 = vmax.f32 %v6757_v6, %v1584_v43  ;;  %v5710_v22 = vpack.i.bf16 %v1742_v31, %v1735_v46  ;;  %v6841_v42 = vpack.c.bf16 %v1742_v31, %v1735_v46  ;;  %v4473_v46 = vld [vmem:[%s7136_s3 + $0x38] sm:$0xff]  ;;  %v4476_v31 = vld [vmem:[%s7136_s3 + $0x40] sm:$0xff] }
 0x1b2   :  { %5601 = vrot.lane.b32.xlu0 %v5590_v49, %s5749_s16  ;;  %5586 = vrot.lane.b32.xlu1 %v5565_v35, %s5750_s17  ;;  %v1748_v1 = vadd.f32 %v6685_v63, %v1696_v59 }
 0x1b3   :  { %v1588_v5 = vpop.f32.mrb[98].mxu1  ;;  %v1749_v6 = vadd.f32 %v6685_v63, %v1697_v39  ;;  %v4144_v63 = vld [vmem:[%s7137_s4] sm:$0xff] }
 0x1b4   :  { %v1703_v25 = vmax.f32 %v6762_v8, %v1588_v5  ;;  %v1590_v62 = vpop.f32.mrb[99].mxu1 }
 0x1b5   :  { %v1704_v45 = vmax.f32 %v6767_v15, %v1590_v62  ;;  %v4480_v62 = vld [vmem:[%s7136_s3 + $0x50] sm:$0xff] }
 0x1b6   :  { %v1755_v9 = vadd.f32 %v6713_v10, %v1703_v25  ;;  %5611 = vrot.lane.b32.xlu0 %v5590_v49, %s5750_s17  ;;  %5596 = vrot.lane.b32.xlu1 %v5595_v55, %s5748_s0  ;;  %v4477_v25 = vld [vmem:[%s7136_s3 + $0x48] sm:$0xff] }
 0x1b7   :  { %v1756_v58 = vadd.f32 %v6713_v10, %v1704_v45 }
 0x1b8   :  { %v5685_v47 = vpack.i.bf16 %v1755_v9, %v1748_v1  ;;  %v6851_v27 = vpack.c.bf16 %v1755_v9, %v1748_v1 }
 0x1b9   :  { %v5715_v13 = vpack.i.bf16 %v1756_v58, %v1749_v6  ;;  %v6853_v8 = vpack.c.bf16 %v1756_v58, %v1749_v6 }
 0x1ba   :  { %5621 = vrot.lane.b32.xlu0 %v6698_v4, %s5748_s0  ;;  %5606 = vrot.lane.b32.xlu1 %v5595_v55, %s5749_s16 }
 0x1be   :  { %5631 = vrot.lane.b32.xlu0 %v6698_v4, %s5749_s16  ;;  %5616 = vrot.lane.b32.xlu1 %v5595_v55, %s5750_s17 }
 0x1c2   :  { %5641 = vrot.lane.b32.xlu0 %v6698_v4, %s5750_s17  ;;  %5626 = vrot.lane.b32.xlu1 %v6731_v18, %s5748_s0  ;;  %v4161_v4 = vld [vmem:[%s7138_s6] sm:$0x3] }
 0x1c6   :  { %5651 = vrot.lane.b32.xlu0 %v6701_v26, %s5748_s0  ;;  %5636 = vrot.lane.b32.xlu1 %v6731_v18, %s5749_s16 }
 0x1ca   :  { %5661 = vrot.lane.b32.xlu0 %v6701_v26, %s5749_s16  ;;  %5646 = vrot.lane.b32.xlu1 %v6731_v18, %s5750_s17 }
 0x1ce   :  { %5671 = vrot.lane.b32.xlu0 %v6701_v26, %s5750_s17  ;;  %5656 = vrot.lane.b32.xlu1 %v6735_v29, %s5748_s0  ;;  %v4145_v26 = vld [vmem:[%s7137_s4 + $0x8] sm:$0xff] }
 0x1d2   :  { %5666 = vrot.lane.b32.xlu1 %v6735_v29, %s5749_s16  ;;  %5681 = vrot.lane.b32.xlu0 %v5680_v20, %s5748_s0 }
 0x1d6   :  { %5676 = vrot.lane.b32.xlu1 %v6735_v29, %s5750_s17  ;;  %5691 = vrot.lane.b32.xlu0 %v5680_v20, %s5749_s16 }
 0x1da   :  { %5701 = vrot.lane.b32.xlu0 %v5680_v20, %s5750_s17  ;;  %5686 = vrot.lane.b32.xlu1 %v5685_v47, %s5748_s0 }
 0x1de   :  { %5711 = vrot.lane.b32.xlu0 %v5710_v22, %s5748_s0  ;;  %5696 = vrot.lane.b32.xlu1 %v5685_v47, %s5749_s16 }
 0x1e2   :  { %5721 = vrot.lane.b32.xlu0 %v5710_v22, %s5749_s16  ;;  %5706 = vrot.lane.b32.xlu1 %v5685_v47, %s5750_s17 }
 0x1e6   :  { %5731 = vrot.lane.b32.xlu0 %v5710_v22, %s5750_s17  ;;  %5716 = vrot.lane.b32.xlu1 %v5715_v13, %s5748_s0 }
 0x1ea   :  { %4148 = vperm.xlu0 %5558, %v4144_v63   ;;  %5726 = vrot.lane.b32.xlu1 %v5715_v13, %s5749_s16  ;;  %v4484_v63 = vld [vmem:[%s7136_s3 + $0x60] sm:$0xff] }
 0x1ee   :  { %4164 = vperm.xlu0 %5558, %v4161_v4   ;;  %5736 = vrot.lane.b32.xlu1 %v5715_v13, %s5750_s17  ;;  %v4481_v13 = vld [vmem:[%s7136_s3 + $0x58] sm:$0xff] }
 0x1f2   :  { %4153 = vperm.xlu1 %5559, %v4145_v26  }
 0x214   :  { %v5562_v10 = vpop.permute.xlu0 %5561 }
 0x215   :  { %v5564_v18 = vunpack.i.h.bf16 %v5562_v10  ;;  %v5563_v29 = vunpack.i.l.bf16 %v5562_v10 }
 0x217   :  { %v5300_v15 = vpack.c.bf16 %v5564_v18, %v5563_v29 }
 0x218   :  { %v5572_v19 = vpop.permute.xlu0 %5571 }
 0x219   :  { %5301 = vmatprep.subr.bf16.mxu0 %v5300_v15  ;;  %v5574_v56 = vunpack.i.h.bf16 %v5572_v19  ;;  %v5573_v51 = vunpack.i.l.bf16 %v5572_v19 }
 0x21a   :  { %5303 = vmatpush3.bf16.msra.mxu0 %v5300_v15 }
 0x21b   :  { %v5316_v12 = vpack.c.bf16 %v5574_v56, %v5573_v51 }
 0x21c   :  { %v5567_v48 = vpop.permute.xlu1 %5566  ;;  %v5582_v16 = vpop.permute.xlu0 %5581 }
 0x21d   :  { %v5569_v11 = vunpack.i.h.bf16 %v5567_v48  ;;  %v5568_v50 = vunpack.i.l.bf16 %v5567_v48  ;;  %v5583_v35 = vunpack.i.l.bf16 %v5582_v16 }
 0x21f   :  { %v5304_v49 = vpack.c.bf16 %v5569_v11, %v5568_v50  ;;  %v4485_v11 = vld [vmem:[%s7136_s3 + $0x68] sm:$0xff]  ;;  %v4488_v50 = vld [vmem:[%s7136_s3 + $0x70] sm:$0xff] }
 0x220   :  { %v5577_v21 = vpop.permute.xlu1 %5576  ;;  %v5592_v40 = vpop.permute.xlu0 %5591 }
 0x221   :  { %5305 = vmatprep.subr.bf16.mxu0 %v5304_v49  ;;  %v5579_v14 = vunpack.i.h.bf16 %v5577_v21  ;;  %v5578_v3 = vunpack.i.l.bf16 %v5577_v21  ;;  %v5594_v23 = vunpack.i.h.bf16 %v5592_v40  ;;  %v5593_v59 = vunpack.i.l.bf16 %v5592_v40 }
 0x222   :  { %5307 = vmatpush3.bf16.msra.mxu0 %v5304_v49 }
 0x223   :  { %5309 = vmatprep.subr.bf16.mxu0 %v6804_v60  ;;  %v5320_v28 = vpack.c.bf16 %v5579_v14, %v5578_v3  ;;  %v5340_v20 = vpack.c.bf16 %v5594_v23, %v5593_v59 }
 0x224   :  { %v5587_v55 = vpop.permute.xlu1 %5586  ;;  %v5602_v5 = vpop.permute.xlu0 %5601 }
 0x225   :  { %4835 = vmatmul.mubr.msk.f32.vlgmr.msra.gmra.mrb[12].mxu0 %vm1779_vm1, %v4463_v57  ;;  %v5589_v54 = vunpack.i.h.bf16 %v5587_v55  ;;  %v5588_v61 = vunpack.i.l.bf16 %v5587_v55  ;;  %v5603_v45 = vunpack.i.l.bf16 %v5602_v5  ;;  %v4489_v57 = vld [vmem:[%s7136_s3 + $0x78] sm:$0xff] }
 0x226   :  { %5311 = vmatpush3.bf16.msra.mxu0 %v6804_v60  ;;  %4845 = vmatprep.mubr.msk.f32.mxu0 %vm1779_vm1, %v1758_v34  ;;  %v5584_v60 = vunpack.i.h.bf16 %v5582_v16  ;;  %v4492_v34 = vld [vmem:[%s7136_s3 + $0x80] sm:$0xff] }
 0x227   :  { %5313 = vmatprep.subr.bf16.mxu0 %v6823_v2  ;;  %v5328_v30 = vpack.c.bf16 %v5589_v54, %v5588_v61  ;;  %v4497_v61 = vld [vmem:[%s7136_s3 + $0x98] sm:$0xff] }
 0x228   :  { %v5597_v43 = vpop.permute.xlu1 %5596  ;;  %v5612_v47 = vpop.permute.xlu0 %5611 }
 0x229   :  { %v5599_v39 = vunpack.i.h.bf16 %v5597_v43  ;;  %v5598_v22 = vunpack.i.l.bf16 %v5597_v43  ;;  %v5614_v4 = vunpack.i.h.bf16 %v5612_v47  ;;  %v5613_v26 = vunpack.i.l.bf16 %v5612_v47  ;;  %v4501_v43 = vld [vmem:[%s7136_s3 + $0xa8] sm:$0xff]  ;;  %v4512_v47 = vld [vmem:[%s7136_s3 + $0xd0] sm:$0xff] }
 0x22a   :  { %5315 = vmatpush3.bf16.msra.mxu0 %v6823_v2  ;;  %v5324_v2 = vpack.c.bf16 %v5584_v60, %v5583_v35 }
 0x22b   :  { %5317 = vmatprep.subr.bf16.mxu0 %v5316_v12  ;;  %v5344_v1 = vpack.c.bf16 %v5599_v39, %v5598_v22  ;;  %v5356_v29 = vpack.c.bf16 %v5614_v4, %v5613_v26 }
 0x22c   :  { %v5607_v9 = vpop.permute.xlu1 %5606  ;;  %v5622_v19 = vpop.permute.xlu0 %5621 }
 0x22d   :  { %4846 = vmatmul.mubr.msk.f32.vlgmr.msra.gmra.mrb[12].mxu0 %vm1779_vm1, %v1759_v53  ;;  %v5609_v6 = vunpack.i.h.bf16 %v5607_v9  ;;  %v5608_v58 = vunpack.i.l.bf16 %v5607_v9  ;;  %v5624_v56 = vunpack.i.h.bf16 %v5622_v19  ;;  %v5623_v51 = vunpack.i.l.bf16 %v5622_v19  ;;  %v4493_v53 = vld [vmem:[%s7136_s3 + $0x88] sm:$0xff] }
 0x22e   :  { %5319 = vmatpush3.bf16.msra.mxu0 %v5316_v12  ;;  %4856 = vmatprep.mubr.msk.f32.mxu0 %vm1779_vm1, %v4468_v7  ;;  %v4496_v7 = vld [vmem:[%s7136_s3 + $0x90] sm:$0xff] }
 0x22f   :  { %5321 = vmatprep.subr.bf16.mxu0 %v5320_v28  ;;  %v5352_v10 = vpack.c.bf16 %v5609_v6, %v5608_v58  ;;  %v5372_v12 = vpack.c.bf16 %v5624_v56, %v5623_v51  ;;  %v4509_v58 = vld [vmem:[%s7136_s3 + $0xc8] sm:$0xff]  ;;  %v4520_v51 = vld [vmem:[%s7136_s3 + $0xf0] sm:$0xff] }
 0x230   :  { %v5617_v18 = vpop.permute.xlu1 %5616  ;;  %v5632_v16 = vpop.permute.xlu0 %5631  ;;  %v4517_v56 = vld [vmem:[%s7136_s3 + $0xe8] sm:$0xff] }
 0x231   :  { %v5619_v15 = vunpack.i.h.bf16 %v5617_v18  ;;  %v5618_v48 = vunpack.i.l.bf16 %v5617_v18  ;;  %v5633_v60 = vunpack.i.l.bf16 %v5632_v16 }
 0x232   :  { %5323 = vmatpush3.bf16.msra.mxu0 %v5320_v28 }
 0x233   :  { %5325 = vmatprep.subr.bf16.mxu0 %v5324_v2  ;;  %v5360_v49 = vpack.c.bf16 %v5619_v15, %v5618_v48  ;;  %v4516_v15 = vld [vmem:[%s7136_s3 + $0xe0] sm:$0xff] }
 0x234   :  { %v5627_v21 = vpop.permute.xlu1 %5626  ;;  %v5642_v54 = vpop.permute.xlu0 %5641 }
 0x235   :  { %4857 = vmatmul.mubr.msk.f32.vlgmr.msra.gmra.mrb[12].mxu0 %vm1779_vm1, %v4469_v37  ;;  %v5629_v14 = vunpack.i.h.bf16 %v5627_v21  ;;  %v5628_v3 = vunpack.i.l.bf16 %v5627_v21  ;;  %v4500_v37 = vld [vmem:[%s7136_s3 + $0xa0] sm:$0xff] }
 0x236   :  { %5327 = vmatpush3.bf16.msra.mxu0 %v5324_v2  ;;  %4867 = vmatprep.mubr.msk.f32.mxu0 %vm1779_vm1, %v4472_v33  ;;  %v5644_v33 = vunpack.i.h.bf16 %v5642_v54 }
 0x237   :  { %5329 = vmatprep.subr.bf16.mxu0 %v5328_v30  ;;  %v5376_v35 = vpack.c.bf16 %v5629_v14, %v5628_v3  ;;  %v4521_v14 = vld [vmem:[%s7136_s3 + $0xf8] sm:$0xff]  ;;  %v4524_v3 = vld [vmem:[%s7136_s3 + $0x100] sm:$0xff] }
 0x238   :  { %v5637_v28 = vpop.permute.xlu1 %5636  ;;  %v5652_v22 = vpop.permute.xlu0 %5651 }
 0x239   :  { %v5639_v55 = vunpack.i.h.bf16 %v5637_v28  ;;  %v5638_v2 = vunpack.i.l.bf16 %v5637_v28 }
 0x23a   :  { %5331 = vmatpush3.bf16.msra.mxu0 %v5328_v30  ;;  %v5643_v30 = vunpack.i.l.bf16 %v5642_v54 }
 0x23b   :  { %5333 = vmatprep.subr.bf16.mxu0 %v6806_v17  ;;  %v5384_v40 = vpack.c.bf16 %v5639_v55, %v5638_v2  ;;  %v4528_v55 = vld [vmem:[%s7136_s3 + $0x110] sm:$0xff] }
 0x23c   :  { %v5662_v6 = vpop.permute.xlu0 %5661 }
 0x23d   :  { %4868 = vmatmul.mubr.msk.f32.vlgmr.msra.gmra.mrb[12].mxu0 %vm1779_vm1, %v4473_v46  ;;  %v5647_v46 = vpop.permute.xlu1 %5646 }
 0x23e   :  { %5335 = vmatpush3.bf16.msra.mxu0 %v6806_v17  ;;  %4878 = vmatprep.mubr.msk.f32.mxu0 %vm1779_vm1, %v4476_v31  ;;  %v5604_v17 = vunpack.i.h.bf16 %v5602_v5  ;;  %v5388_v31 = vpack.c.bf16 %v5644_v33, %v5643_v30  ;;  %v5649_v23 = vunpack.i.h.bf16 %v5647_v46  ;;  %v5648_v59 = vunpack.i.l.bf16 %v5647_v46  ;;  %v4505_v5 = vld [vmem:[%s7136_s3 + $0xb8] sm:$0xff]  ;;  %v4532_v46 = vld [vmem:[%s7136_s3 + $0x120] sm:$0xff] }
 0x23f   :  { %5337 = vmatprep.subr.bf16.mxu0 %v6825_v52 }
 0x240   :  { %v5392_v39 = vpack.c.bf16 %v5649_v23, %v5648_v59  ;;  %v5672_v18 = vpop.permute.xlu0 %5671 }
 0x241   :  { %v5674_v48 = vunpack.i.h.bf16 %v5672_v18 }
 0x242   :  { %5339 = vmatpush3.bf16.msra.mxu0 %v6825_v52  ;;  %v5348_v52 = vpack.c.bf16 %v5604_v17, %v5603_v45  ;;  %v5653_v17 = vunpack.i.l.bf16 %v5652_v22  ;;  %v5657_v45 = vpop.permute.xlu1 %5656 }
 0x243   :  { %5341 = vmatprep.subr.bf16.mxu0 %v5340_v20  ;;  %v5659_v9 = vunpack.i.h.bf16 %v5657_v45 }
 0x245   :  { %4879 = vmatmul.mubr.msk.f32.vlgmr.msra.gmra.mrb[12].mxu0 %vm1779_vm1, %v4477_v25  ;;  %v4508_v25 = vld [vmem:[%s7136_s3 + $0xc0] sm:$0xff] }
 0x246   :  { %5343 = vmatpush3.bf16.msra.mxu0 %v5340_v20  ;;  %4889 = vmatprep.mubr.msk.f32.mxu0 %vm1779_vm1, %v4480_v62  ;;  %v4504_v20 = vld [vmem:[%s7136_s3 + $0xb0] sm:$0xff]  ;;  %v5654_v62 = vunpack.i.h.bf16 %v5652_v22  ;;  %v5667_v4 = vpop.permute.xlu1 %5666 }
 0x247   :  { %5345 = vmatprep.subr.bf16.mxu0 %v5344_v1  ;;  %v5669_v26 = vunpack.i.h.bf16 %v5667_v4 }
 0x24a   :  { %5347 = vmatpush3.bf16.msra.mxu0 %v5344_v1  ;;  %v5404_v1 = vpack.c.bf16 %v5654_v62, %v5653_v17 }
 0x24b   :  { %5349 = vmatprep.subr.bf16.mxu0 %v5348_v52 }
 0x24d   :  { %4890 = vmatmul.mubr.msk.f32.vlgmr.msra.gmra.mrb[12].mxu0 %vm1779_vm1, %v4481_v13  ;;  %v5663_v13 = vunpack.i.l.bf16 %v5662_v6 }
 0x24e   :  { %5351 = vmatpush3.bf16.msra.mxu0 %v5348_v52  ;;  %4900 = vmatprep.mubr.msk.f32.mxu0 %vm1779_vm1, %v4484_v63  ;;  %v5658_v52 = vunpack.i.l.bf16 %v5657_v45  ;;  %v4537_v45 = vld [vmem:[%s7136_s3 + $0x138] sm:$0xff] }
 0x24f   :  { %5353 = vmatprep.subr.bf16.mxu0 %v5352_v10 }
 0x250   :  { %v5408_v63 = vpack.c.bf16 %v5659_v9, %v5658_v52 }
 0x252   :  { %5355 = vmatpush3.bf16.msra.mxu0 %v5352_v10  ;;  %v5668_v10 = vunpack.i.l.bf16 %v5667_v4  ;;  %v4544_v4 = vld [vmem:[%s7136_s3 + $0x150] sm:$0xff] }
 0x253   :  { %5357 = vmatprep.subr.bf16.mxu0 %v5356_v29 }
 0x255   :  { %4901 = vmatmul.mubr.msk.f32.vlgmr.msra.gmra.mrb[12].mxu0 %vm1779_vm1, %v4485_v11  ;;  %v5673_v11 = vunpack.i.l.bf16 %v5672_v18 }
 0x256   :  { %5359 = vmatpush3.bf16.msra.mxu0 %v5356_v29  ;;  %4911 = vmatprep.mubr.msk.f32.mxu0 %vm1779_vm1, %v4488_v50  ;;  %v4513_v29 = vld [vmem:[%s7136_s3 + $0xd8] sm:$0xff]  ;;  %v5416_v50 = vpack.c.bf16 %v5669_v26, %v5668_v10 }
 0x257   :  { %5361 = vmatprep.subr.bf16.mxu0 %v5360_v49  ;;  %v5420_v19 = vpack.c.bf16 %v5674_v48, %v5673_v11  ;;  %v4545_v48 = vld [vmem:[%s7136_s3 + $0x158] sm:$0xff]  ;;  %v4548_v11 = vld [vmem:[%s7136_s3 + $0x160] sm:$0xff] }
 0x25a   :  { %5363 = vmatpush3.bf16.msra.mxu0 %v5360_v49  ;;  %v5677_v49 = vpop.permute.xlu1 %5676 }
 0x25b   :  { %5365 = vmatprep.subr.bf16.mxu0 %v6706_v32 }
 0x25d   :  { %4912 = vmatmul.mubr.msk.f32.vlgmr.msra.gmra.mrb[12].mxu0 %vm1779_vm1, %v4489_v57  ;;  %v5679_v57 = vunpack.i.h.bf16 %v5677_v49 }
 0x25e   :  { %5367 = vmatpush3.bf16.msra.mxu0 %v6706_v32  ;;  %4922 = vmatprep.mubr.msk.f32.mxu0 %vm1779_vm1, %v4492_v34  ;;  %v5634_v32 = vunpack.i.h.bf16 %v5632_v16  ;;  %v5678_v34 = vunpack.i.l.bf16 %v5677_v49 }
 0x25f   :  { %5369 = vmatprep.subr.bf16.mxu0 %v6733_v38 }
 0x260   :  { %v5424_v21 = vpack.c.bf16 %v5679_v57, %v5678_v34 }
 0x262   :  { %5371 = vmatpush3.bf16.msra.mxu0 %v6733_v38  ;;  %v5380_v38 = vpack.c.bf16 %v5634_v32, %v5633_v60 }
 0x263   :  { %5373 = vmatprep.subr.bf16.mxu0 %v5372_v12 }
 0x265   :  { %4923 = vmatmul.mubr.msk.f32.vlgmr.msra.gmra.mrb[12].mxu0 %vm1779_vm1, %v4493_v53 }
 0x266   :  { %5375 = vmatpush3.bf16.msra.mxu0 %v5372_v12  ;;  %4933 = vmatprep.mubr.msk.f32.mxu0 %vm1779_vm1, %v4496_v7  ;;  %v5682_v12 = vpop.permute.xlu0 %5681  ;;  %v5687_v7 = vpop.permute.xlu1 %5686 }
 0x267   :  { %5377 = vmatprep.subr.bf16.mxu0 %v5376_v35  ;;  %v5684_v16 = vunpack.i.h.bf16 %v5682_v12  ;;  %v5683_v53 = vunpack.i.l.bf16 %v5682_v12  ;;  %v5689_v60 = vunpack.i.h.bf16 %v5687_v7  ;;  %v4552_v12 = vld [vmem:[%s7136_s3 + $0x170] sm:$0xff] }
 0x269   :  { %v5436_v32 = vpack.c.bf16 %v5684_v16, %v5683_v53  ;;  %v4556_v16 = vld [vmem:[%s7136_s3 + $0x180] sm:$0xff]  ;;  %v4557_v53 = vld [vmem:[%s7136_s3 + $0x188] sm:$0xff] }
 0x26a   :  { %5379 = vmatpush3.bf16.msra.mxu0 %v5376_v35  ;;  %v5688_v35 = vunpack.i.l.bf16 %v5687_v7  ;;  %v5692_v28 = vpop.permute.xlu0 %5691  ;;  %v5751_v7 = vmov 0.0|0.0  }
 0x26b   :  { %5381 = vmatprep.subr.bf16.mxu0 %v5380_v38  ;;  %v5693_v2 = vunpack.i.l.bf16 %v5692_v28  ;;  %5500 = vmatprep.subr.bf16.mxu1 %v5751_v7 }
 0x26c   :  { %v5440_v54 = vpack.c.bf16 %v5689_v60, %v5688_v35 }
 0x26d   :  { %4934 = vmatmul.mubr.msk.f32.vlgmr.msra.gmra.mrb[12].mxu0 %vm1779_vm1, %v4497_v61  ;;  %v5697_v61 = vpop.permute.xlu1 %5696 }
 0x26e   :  { %5383 = vmatpush3.bf16.msra.mxu0 %v5380_v38  ;;  %4944 = vmatprep.mubr.msk.f32.mxu0 %vm1779_vm1, %v4500_v37  ;;  %v4525_v38 = vld [vmem:[%s7136_s3 + $0x108] sm:$0xff]  ;;  %v5699_v37 = vunpack.i.h.bf16 %v5697_v61  ;;  %v5698_v33 = vunpack.i.l.bf16 %v5697_v61  ;;  %v5702_v30 = vpop.permute.xlu0 %5701 }
 0x26f   :  { %5385 = vmatprep.subr.bf16.mxu0 %v5384_v40  ;;  %v5703_v23 = vunpack.i.l.bf16 %v5702_v30 }
 0x270   :  { %v5448_v59 = vpack.c.bf16 %v5699_v37, %v5698_v33 }
 0x272   :  { %5387 = vmatpush3.bf16.msra.mxu0 %v5384_v40  ;;  %v4529_v40 = vld [vmem:[%s7136_s3 + $0x118] sm:$0xff]  ;;  %v5712_v17 = vpop.permute.xlu0 %5711 }
 0x273   :  { %5389 = vmatprep.subr.bf16.mxu0 %v5388_v31  ;;  %v5714_v9 = vunpack.i.h.bf16 %v5712_v17  ;;  %v5713_v52 = vunpack.i.l.bf16 %v5712_v17 }
 0x275   :  { %4945 = vmatmul.mubr.msk.f32.vlgmr.msra.gmra.mrb[12].mxu0 %vm1779_vm1, %v4501_v43  ;;  %v5707_v43 = vpop.permute.xlu1 %5706 }
 0x276   :  { %5391 = vmatpush3.bf16.msra.mxu0 %v5388_v31  ;;  %4955 = vmatprep.mubr.msk.f32.mxu0 %vm1779_vm1, %v4504_v20  ;;  %v5704_v31 = vunpack.i.h.bf16 %v5702_v30  ;;  %v5708_v22 = vunpack.i.l.bf16 %v5707_v43 }
 0x277   :  { %5393 = vmatprep.subr.bf16.mxu0 %v5392_v39 }
 0x278   :  { %v5452_v20 = vpack.c.bf16 %v5704_v31, %v5703_v23 }
 0x27a   :  { %5395 = vmatpush3.bf16.msra.mxu0 %v5392_v39  ;;  %v5709_v39 = vunpack.i.h.bf16 %v5707_v43 }
 0x27b   :  { %5397 = vmatprep.subr.bf16.mxu0 %v6708_v24 }
 0x27c   :  { %v5456_v62 = vpack.c.bf16 %v5709_v39, %v5708_v22 }
 0x27d   :  { %4956 = vmatmul.mubr.msk.f32.vlgmr.msra.gmra.mrb[12].mxu0 %vm1779_vm1, %v4505_v5  ;;  %v4533_v5 = vld [vmem:[%s7136_s3 + $0x128] sm:$0xff] }
 0x27e   :  { %5399 = vmatpush3.bf16.msra.mxu0 %v6708_v24  ;;  %4966 = vmatprep.mubr.msk.f32.mxu0 %vm1779_vm1, %v4508_v25  ;;  %v5664_v24 = vunpack.i.h.bf16 %v5662_v6  ;;  %v4536_v25 = vld [vmem:[%s7136_s3 + $0x130] sm:$0xff]  ;;  %v5717_v6 = vpop.permute.xlu1 %5716 }
 0x27f   :  { %5401 = vmatprep.subr.bf16.mxu0 %v6737_v41 }
 0x282   :  { %5403 = vmatpush3.bf16.msra.mxu0 %v6737_v41  ;;  %v5412_v41 = vpack.c.bf16 %v5664_v24, %v5663_v13  ;;  %v5718_v24 = vunpack.i.l.bf16 %v5717_v6  ;;  %v5722_v13 = vpop.permute.xlu0 %5721  ;;  %v5727_v10 = vpop.permute.xlu1 %5726 }
 0x283   :  { %5405 = vmatprep.subr.bf16.mxu0 %v5404_v1  ;;  %v5729_v18 = vunpack.i.h.bf16 %v5727_v10 }
 0x285   :  { %4967 = vmatmul.mubr.msk.f32.vlgmr.msra.gmra.mrb[12].mxu0 %vm1779_vm1, %v4509_v58  ;;  %v5468_v58 = vpack.c.bf16 %v5714_v9, %v5713_v52 }
 0x286   :  { %5407 = vmatpush3.bf16.msra.mxu0 %v5404_v1  ;;  %4977 = vmatprep.mubr.msk.f32.mxu0 %vm1779_vm1, %v4512_v47  ;;  %v4540_v1 = vld [vmem:[%s7136_s3 + $0x140] sm:$0xff]  ;;  %v5719_v47 = vunpack.i.h.bf16 %v5717_v6  ;;  %v5737_v57 = vpop.permute.xlu1 %5736 }
 0x287   :  { %5409 = vmatprep.subr.bf16.mxu0 %v5408_v63 }
 0x288   :  { %v5472_v26 = vpack.c.bf16 %v5719_v47, %v5718_v24 }
 0x28a   :  { %5411 = vmatpush3.bf16.msra.mxu0 %v5408_v63  ;;  %v4541_v63 = vld [vmem:[%s7136_s3 + $0x148] sm:$0xff]  ;;  %v4154_v60 = vpop.permute.xlu1 %4153 }
 0x28b   :  { %5413 = vmatprep.subr.bf16.mxu0 %v5412_v41 }
 0x28d   :  { %4978 = vmatmul.mubr.msk.f32.vlgmr.msra.gmra.mrb[12].mxu0 %vm1779_vm1, %v4513_v29  ;;  %v5728_v29 = vunpack.i.l.bf16 %v5727_v10 }
 0x28e   :  { %5415 = vmatpush3.bf16.msra.mxu0 %v5412_v41  ;;  %4988 = vmatprep.mubr.msk.f32.mxu0 %vm1779_vm1, %v4516_v15  ;;  %v5723_v41 = vunpack.i.l.bf16 %v5722_v13  ;;  %v5732_v15 = vpop.permute.xlu0 %5731 }
 0x28f   :  { %5417 = vmatprep.subr.bf16.mxu0 %v5416_v50  ;;  %v5733_v49 = vunpack.i.l.bf16 %v5732_v15 }
 0x292   :  { %5419 = vmatpush3.bf16.msra.mxu0 %v5416_v50  ;;  %v5734_v50 = vunpack.i.h.bf16 %v5732_v15 }
 0x293   :  { %5421 = vmatprep.subr.bf16.mxu0 %v5420_v19 }
 0x294   :  { %v5484_v34 = vpack.c.bf16 %v5734_v50, %v5733_v49 }
 0x295   :  { %4989 = vmatmul.mubr.msk.f32.vlgmr.msra.gmra.mrb[12].mxu0 %vm1779_vm1, %v4517_v56  ;;  %v5739_v56 = vunpack.i.h.bf16 %v5737_v57 }
 0x296   :  { %5423 = vmatpush3.bf16.msra.mxu0 %v5420_v19  ;;  %4999 = vmatprep.mubr.msk.f32.mxu0 %vm1779_vm1, %v4520_v51  ;;  %v5480_v19 = vpack.c.bf16 %v5729_v18, %v5728_v29  ;;  %v5738_v51 = vunpack.i.l.bf16 %v5737_v57 }
 0x297   :  { %5425 = vmatprep.subr.bf16.mxu0 %v5424_v21 }
 0x29a   :  { %5427 = vmatpush3.bf16.msra.mxu0 %v5424_v21  ;;  %v4549_v21 = vld [vmem:[%s7136_s3 + $0x168] sm:$0xff] }
 0x29b   :  { %5429 = vmatprep.subr.bf16.mxu0 %v6839_v0 }
 0x29d   :  { %5000 = vmatmul.mubr.msk.f32.vlgmr.msra.gmra.mrb[12].mxu0 %vm1779_vm1, %v4521_v14  ;;  %v5488_v14 = vpack.c.bf16 %v5739_v56, %v5738_v51 }
 0x29e   :  { %5431 = vmatpush3.bf16.msra.mxu0 %v6839_v0  ;;  %5010 = vmatprep.mubr.msk.f32.mxu0 %vm1779_vm1, %v4524_v3  ;;  %v5694_v0 = vunpack.i.h.bf16 %v5692_v28  ;;  %v4553_v3 = vld [vmem:[%s7136_s3 + $0x178] sm:$0xff] }
 0x29f   :  { %5433 = vmatprep.subr.bf16.mxu0 %v6851_v27 }
 0x2a2   :  { %5435 = vmatpush3.bf16.msra.mxu0 %v6851_v27  ;;  %v5444_v27 = vpack.c.bf16 %v5694_v0, %v5693_v2 }
 0x2a3   :  { %5437 = vmatprep.subr.bf16.mxu0 %v5436_v32 }
 0x2a5   :  { %5011 = vmatmul.mubr.msk.f32.vlgmr.msra.gmra.mrb[12].mxu0 %vm1779_vm1, %v4525_v38 }
 0x2a6   :  { %5439 = vmatpush3.bf16.msra.mxu0 %v5436_v32  ;;  %5021 = vmatprep.mubr.msk.f32.mxu0 %vm1779_vm1, %v4528_v55  ;;  %v7176_v32 = vmov 0.0  }
 0x2a7   :  { %5441 = vmatprep.subr.bf16.mxu0 %v5440_v54  ;;  %5105 = vmatprep.mubr.msk.f32.mxu1 %vm5752_vm2, %v7176_v32 }
 0x2aa   :  { %5443 = vmatpush3.bf16.msra.mxu0 %v5440_v54  ;;  %v4160_v54 = vld [vmem:[%s7139_s5] sm:$0x3] }
 0x2ab   :  { %5445 = vmatprep.subr.bf16.mxu0 %v5444_v27 }
 0x2ad   :  { %5022 = vmatmul.mubr.msk.f32.vlgmr.msra.gmra.mrb[12].mxu0 %vm1779_vm1, %v4529_v40 }
 0x2ae   :  { %5447 = vmatpush3.bf16.msra.mxu0 %v5444_v27  ;;  %5032 = vmatprep.mubr.msk.f32.mxu0 %vm1779_vm1, %v4532_v46 }
 0x2af   :  { %5449 = vmatprep.subr.bf16.mxu0 %v5448_v59 }
 0x2b2   :  { %5451 = vmatpush3.bf16.msra.mxu0 %v5448_v59 }
 0x2b3   :  { %5453 = vmatprep.subr.bf16.mxu0 %v5452_v20 }
 0x2b5   :  { %5033 = vmatmul.mubr.msk.f32.vlgmr.msra.gmra.mrb[12].mxu0 %vm1779_vm1, %v4533_v5 }
 0x2b6   :  { %5455 = vmatpush3.bf16.msra.mxu0 %v5452_v20  ;;  %5043 = vmatprep.mubr.msk.f32.mxu0 %vm1779_vm1, %v4536_v25 }
 0x2b7   :  { %5457 = vmatprep.subr.bf16.mxu0 %v5456_v62 }
 0x2ba   :  { %5459 = vmatpush3.bf16.msra.mxu0 %v5456_v62 }
 0x2bb   :  { %5461 = vmatprep.subr.bf16.mxu0 %v6841_v42 }
 0x2bd   :  { %5044 = vmatmul.mubr.msk.f32.vlgmr.msra.gmra.mrb[12].mxu0 %vm1779_vm1, %v4537_v45 }
 0x2be   :  { %5463 = vmatpush3.bf16.msra.mxu0 %v6841_v42  ;;  %5054 = vmatprep.mubr.msk.f32.mxu0 %vm1779_vm1, %v4540_v1  ;;  %v5724_v42 = vunpack.i.h.bf16 %v5722_v13 }
 0x2bf   :  { %5465 = vmatprep.subr.bf16.mxu0 %v6853_v8 }
 0x2c2   :  { %5467 = vmatpush3.bf16.msra.mxu0 %v6853_v8  ;;  %v5476_v8 = vpack.c.bf16 %v5724_v42, %v5723_v41 }
 0x2c3   :  { %5469 = vmatprep.subr.bf16.mxu0 %v5468_v58 }
 0x2c5   :  { %5055 = vmatmul.mubr.msk.f32.vlgmr.msra.gmra.mrb[12].mxu0 %vm1779_vm1, %v4541_v63 }
 0x2c6   :  { %5471 = vmatpush3.bf16.msra.mxu0 %v5468_v58  ;;  %5065 = vmatprep.mubr.msk.f32.mxu0 %vm1779_vm1, %v4544_v4 }
 0x2c7   :  { %5473 = vmatprep.subr.bf16.mxu0 %v5472_v26 }
 0x2ca   :  { %5475 = vmatpush3.bf16.msra.mxu0 %v5472_v26 }
 0x2cb   :  { %5477 = vmatprep.subr.bf16.mxu0 %v5476_v8 }
 0x2cd   :  { %5066 = vmatmul.mubr.msk.f32.vlgmr.msra.gmra.mrb[12].mxu0 %vm1779_vm1, %v4545_v48 }
 0x2ce   :  { %5479 = vmatpush3.bf16.msra.mxu0 %v5476_v8  ;;  %5076 = vmatprep.mubr.msk.f32.mxu0 %vm1779_vm1, %v4548_v11 }
 0x2cf   :  { %5481 = vmatprep.subr.bf16.mxu0 %v5480_v19 }
 0x2d2   :  { %5483 = vmatpush3.bf16.msra.mxu0 %v5480_v19 }
 0x2d3   :  { %5485 = vmatprep.subr.bf16.mxu0 %v5484_v34 }
 0x2d5   :  { %5077 = vmatmul.mubr.msk.f32.vlgmr.msra.gmra.mrb[12].mxu0 %vm1779_vm1, %v4549_v21 }
 0x2d6   :  { %5487 = vmatpush3.bf16.msra.mxu0 %v5484_v34  ;;  %5087 = vmatprep.mubr.msk.f32.mxu0 %vm1779_vm1, %v4552_v12 }
 0x2d7   :  { %5489 = vmatprep.subr.bf16.mxu0 %v5488_v14 }
 0x2da   :  { %5491 = vmatpush3.bf16.msra.mxu0 %v5488_v14 }
 0x2db   :  { %5493 = vmatprep.subr.bf16.mxu0 %v6787_v36 }
 0x2dd   :  { %5088 = vmatmul.mubr.msk.f32.vlgmr.msra.gmra.mrb[12].mxu0 %vm1779_vm1, %v4553_v3 }
 0x2de   :  { %5495 = vmatpush3.bf16.msra.mxu0 %v6787_v36  ;;  %5098 = vmatprep.mubr.msk.f32.mxu0 %vm1779_vm1, %v4556_v16  ;;  %v4149_v36 = vpop.permute.xlu0 %4148 }
 0x2df   :  { %5497 = vmatprep.subr.bf16.mxu0 %v6791_v44 }
 0x2e2   :  { %5499 = vmatpush3.bf16.msra.mxu0 %v6791_v44  ;;  %v4165_v61 = vpop.permute.xlu0 %4164 }
 0x2e5   :  { %5099 = vmatmul.mubr.msk.f32.vlgmr.msra.gmra.mrb[12].mxu0 %vm1779_vm1, %v4557_v53 }
 0x3b8   :  { %v5100_v35 = vpop.f32.mrb[12].mxu0 }
 0x3b9   :  { %v4157_v28 = vadd.f32 %v5100_v35, %v4154_v60  ;;  %v4133_v38 = vpop.f32.mrb[13].mxu0 }
 0x3ba   :  { %v4156_v55 = vadd.f32 %v4149_v36, %v4133_v38 }
 0x3bb   :  { %v4159_v0 = vmax.f32 %v4157_v28, 0.0 }
 0x3bc   :  { %v4158_v2 = vmax.f32 %v4156_v55, 0.0 }
 0x3be   :  { %v5501_v44 = vpack.c.bf16 %v4159_v0, %v4158_v2 }
 0x3c0   :  { %5502 = vmatpush3.bf16.msra.mxu1 %v5501_v44 }
 0x3c3   :  { %5106 = vmatmul.mubr.msk.f32.vlgmr.msra.gmra.mrb[100].mxu1 %vm4167_vm3, %v4160_v54 }
 0x496   :  { %v4237_v27 = vpop.f32.mrb[100].mxu1 }
 0x497   :  { %v4238_v37 = vadd.f32 %v4237_v27, %v4165_v61  ;;  %v5107_v33 = vpop.f32.mrb[101].mxu1 }
 0x499   :  { %v4242_v30 = vrot.slane %v4238_v37, 1 }
 0x49b   :  { %v4244_v40 = vmax.f32 %v4238_v37, %v4242_v30 }
 0x49d   :  { %v4245_v46 = vsub.f32 %v4238_v37, %v4244_v40  ;;  %v4249_v31 = vrot.slane %v4244_v40, 7 }
 0x49f   :  { %v4251_v23 = vsub.f32 %v4238_v37, %v4249_v31  ;;  %v4246_v59 = vmul.f32 1.442695, %v4245_v46 }
 0x4a1   :  { %v4252_v43 = vmul.f32 1.442695, %v4251_v23 }
 0x4a3   :  { %5740 = vpow2.f32 %v4252_v43 }
 0x4a4   :  { %5742 = vpow2.f32 %v4246_v59 }
 0x4ad   :  { %v5741_v20 = vpop.eup %5740 }
 0x4ae   :  { %v4255_v39 = vrot.slane %v5741_v20, 1  ;;  %v5743_v22 = vpop.eup %5742 }
 0x4b0   :  { %v4257_v5 = vadd.f32 %v5743_v22, %v4255_v39 }
 0x4b2   :  { %5744 = vrcp.f32 %v4257_v5 }
 0x4bc   :  { %v5745_v25 = vpop.eup %5744 }
 0x4bd   :  { %v4261_v62 = vrot.slane %v5745_v25, 7  ;;  %v4259_v17 = vmul.f32 %v5745_v25, %v5743_v22 }
 0x4bf   :  { %v4263_v45 = vmul.f32 %v5741_v20, %v4261_v62 }
 0x4c1   :  { %v4265_v1 = vsel %vm4264_vm4, %v4259_v17, %v4263_v45 }
 0x4c2   :  { %4267 = vst.msk [vmem:[%s7140_s7] sm:$0x3] %vm4266_vm5, %v4265_v1 }

</bundles_post_ra>
